<compile_context>
chip_gen: v7x
topology: tpu7x:2x2x1
jax: 0.10.0
libtpu: 0.0.40
codegen_flags: <defaults>
</compile_context>

<pallas_src>
import functools

import jax
import jax.numpy as jnp
from jax.experimental import pallas as pl
from jax.experimental.pallas import tpu as pltpu


def rule_kernel(xtc_ref, y_ref, prm_ref, sp_ref, sel_ref, w_ref,
                res_ref, wsse_ref, acc_ref, *, n_taxa, n_rules):
    step = pl.program_id(0)
    n = n_taxa

    xtc = xtc_ref[...]                 # (N+2, TM): rows 0..N-1 = x, N = t, N+1 = cnt
    y = y_ref[...]                     # (N, TM)
    w = w_ref[...]                     # (G, 1)   alpha_rules * rule_select

    x = xtc[0:n, :]                    # (N, TM)  raw abundance
    trow = xtc[n:n + 1, :]             # (1, TM)  time of each row
    cnt = xtc[n + 1:n + 2, :]          # (1, TM)  per-row taxa-count loss weight

    mt = prm_ref[0]                    # (N, 1) mask_times
    mn = prm_ref[1]                    # (N, 1) min_range
    sc = prm_ref[2]                    # (N, 1) 1 / (mrange * split_temp)
    al = prm_ref[3]                    # (N, 1) exp(log_alpha_default)
    be = prm_ref[4]                    # (N, 1) exp(log_beta)

    tmask = (trow >= mt).astype(jnp.float32)      # (N, TM)
    xs = (x - mn) * sc                            # normalized abundance / temp

    # rules[g,m] = prod_c (1 - sel[c,g] * (1 - sigmoid(xs[c,m]-sp[c,g]) * tmask[c,m]))
    rules = None
    for c in range(n):
        xc = xs[c:c + 1, :]                       # (1, TM)
        tmc = tmask[c:c + 1, :]                   # (1, TM)
        spc = sp_ref[c]                           # (G, 1)
        selc = sel_ref[c]                         # (G, 1)
        # sigmoid via tanh -> transcendental on the EUP slot (no VALU divide)
        spl = 0.5 * jnp.tanh(0.5 * (xc - spc)) + 0.5   # (G, TM)
        q = 1.0 - selc * (1.0 - spl * tmc)
        rules = q if rules is None else rules * q

    # weighted sum over the rule axis: R contiguous sublane chunks of height N
    rw = rules * w                                # (G, TM)
    res_rules = rw[0:n, :]
    for r in range(1, n_rules):
        res_rules = res_rules + rw[r * n:(r + 1) * n, :]

    res = (res_rules + al - be * x) * tmask       # (N, TM)
    res_ref[...] = res                            # full-lane unmasked store

    d = res - y

    @pl.when(step == 0)
    def _():
        acc_ref[...] = jnp.zeros_like(acc_ref)

    acc_ref[...] += d * d * cnt                   # pure VPU accumulate, no XLU

    @pl.when(step == pl.num_programs(0) - 1)
    def _():
        wsse_ref[0, 0] = jnp.sum(acc_ref[...])    # single reduce on the last step


def _selectors_eval(q_params):
    # BernoulliVariable eval path: argmin over stacked [logsigmoid(q), logsigmoid(-q)]
    # along dim 0  ==  1.0 where q > 0 else 0.0
    return (q_params > 0).astype(jnp.float32)


def _rule_forward(times, abundance, gradient, params, *, tile_m=512):
    T, S, N = abundance.shape
    R = params["alpha_rules"].shape[1]
    G = R * N
    M = T * S
    f32 = jnp.float32

    inv_temp = 1.0 / params["split_temp"].astype(f32)

    # ---- parameter glue (tiny, fused under jit) ----
    det_sel = _selectors_eval(params["det_q"])                       # (N, R, N)
    rule_sel = _selectors_eval(params["rule_q"])                     # (N, R)
    nonself = (1.0 - jnp.eye(N, dtype=f32))[:, None, :]              # (N, 1, N)
    det_sel = det_sel * nonself
    sp_sig = jax.nn.sigmoid(params["split_points"].astype(f32))      # (N, R, N)

    # reorganize (taxon i, rule r, covariate c) -> [c, g, 1] with g = r*N + i
    sp3 = (jnp.transpose(sp_sig, (2, 1, 0)).reshape(N, G) * inv_temp)[:, :, None]
    sel3 = jnp.transpose(det_sel, (2, 1, 0)).reshape(N, G)[:, :, None]
    w_col = jnp.transpose(params["alpha_rules"].astype(f32) * rule_sel,
                          (1, 0)).reshape(G, 1)

    alpha = jnp.exp(params["log_alpha_default"].astype(f32))
    beta = jnp.exp(params["log_beta"].astype(f32))
    mask_times = params["mask_times"].astype(f32)
    min_range = params["min_range"].astype(f32)
    # NOTE: inherits the reference's behaviour if any mrange == 0 (inf/nan).
    scale = inv_temp / params["mrange"].astype(f32)

    prm3 = jnp.stack([mask_times, min_range, scale, alpha, beta], axis=0)[:, :, None]

    # ---- data slabs: rows on lanes (taxa on sublanes) ----
    xT = abundance.reshape(M, N).astype(f32).T                       # (N, M)
    yT = gradient.reshape(M, N).astype(f32).T                        # (N, M)
    times_f = times.astype(f32)
    t_row = jnp.repeat(times_f, S)                                   # (M,)
    count_t = jnp.sum((times_f[:, None] >= mask_times[None, :]).astype(f32), axis=1)
    cnt_row = jnp.repeat(count_t, S)                                 # (M,)
    total_count = jnp.sum(count_t) * S
    xtc = jnp.concatenate([xT, t_row[None, :], cnt_row[None, :]], axis=0)  # (N+2, M)

    # ---- lane tiling: blocks of TILE_M lanes (multiple of 128) ----
    tile_m = max(128, (min(int(tile_m), 2048) // 128) * 128)
    m_pad128 = ((M + 127) // 128) * 128
    if m_pad128 <= tile_m:
        tile_m = m_pad128                 # single grid step for small M
        m_pad = m_pad128
    else:
        m_pad = ((M + tile_m - 1) // tile_m) * tile_m
    if m_pad != M:
        pad = m_pad - M
        xtc = jnp.pad(xtc, ((0, 0), (0, pad)))   # padded cols have cnt==0 -> no loss
        yT = jnp.pad(yT, ((0, 0), (0, pad)))

    grid = (m_pad // tile_m,)
    kernel = functools.partial(rule_kernel, n_taxa=N, n_rules=R)

    res_t, wsse = pl.pallas_call(
        kernel,
        grid=grid,
        in_specs=[
            pl.BlockSpec((N + 2, tile_m), lambda i: (0, i)),   # x + t + cnt slab
            pl.BlockSpec((N, tile_m), lambda i: (0, i)),       # gradient slab
            pl.BlockSpec((5, N, 1), lambda i: (0, 0, 0)),      # per-taxon params
            pl.BlockSpec((N, G, 1), lambda i: (0, 0, 0)),      # scaled split points [c,g]
            pl.BlockSpec((N, G, 1), lambda i: (0, 0, 0)),      # detector selectors [c,g]
            pl.BlockSpec((G, 1), lambda i: (0, 0)),            # rule weights [g]
        ],
        out_specs=(
            pl.BlockSpec((N, tile_m), lambda i: (0, i)),       # residual (N, M)
            pl.BlockSpec(memory_space=pltpu.MemorySpace.SMEM), # count-weighted SSE
        ),
        out_shape=(
            jax.ShapeDtypeStruct((N, m_pad), f32),
            jax.ShapeDtypeStruct((1, 1), f32),
        ),
        scratch_shapes=[pltpu.VMEM((N, tile_m), f32)],
        compiler_params=pltpu.CompilerParams(
            # loss accumulator is carried across tiles -> "arbitrary".
            dimension_semantics=("arbitrary",),
        ),
    )(xtc, yT, prm3, sp3, sel3, w_col)

    # Gaussian log-likelihood with constant terms hoisted out of the kernel.
    var = params["data_variance"].astype(f32)
    const = -0.5 * jnp.log(var) - 0.5 * jnp.log(2.0 * jnp.pi)
    data_loglik = -0.5 * wsse[0, 0] / var + const * N * total_count
    kl = 0.0  # KL_det + KL_rule + KL_var (see TODOs above)
    loss = -(data_loglik - kl)
    res = res_t[:, :M].T.reshape(T, S, N)
    return loss, res


rule_forward = jax.jit(_rule_forward, static_argnames=("tile_m",))


def rule_forward_ref(times, abundance, gradient, params):
    """Pure-JAX reference mirroring the PyTorch forward (eval mode, learn_variance=False)."""
    T, S, N = abundance.shape
    det_sel = _selectors_eval(params["det_q"])
    rule_sel = _selectors_eval(params["rule_q"])
    nonself = (1.0 - jnp.eye(N, dtype=jnp.float32)).reshape(N, 1, N)
    det_sel = det_sel * nonself
    temp = params["split_temp"]
    sp_sig = jax.nn.sigmoid(params["split_points"])
    xn = (abundance - params["min_range"]) / params["mrange"]
    splits = jax.nn.sigmoid((xn[:, :, None, None, :] - sp_sig[None, None]) / temp)
    tmask_c = (times[:, None, None, None, None]
               >= params["mask_times"][None, None, None, None, :]).astype(jnp.float32)
    detectors = splits * tmask_c
    rules = jnp.prod(1.0 - det_sel[None, None] * (1.0 - detectors), axis=-1)
    res = (jnp.sum(params["alpha_rules"] * rule_sel * rules, axis=-1)
           + jnp.exp(params["log_alpha_default"]))
    tmask = (times[:, None, None] >= params["mask_times"][None, None, :]).astype(jnp.float32)
    res = (res - jnp.exp(params["log_beta"]) * abundance) * tmask
    var = params["data_variance"]
    lp = (-0.5 * (res - gradient) ** 2 / var
          - 0.5 * jnp.log(var) - 0.5 * jnp.log(2.0 * jnp.pi))
    data_loglik = 0.0
    for i in range(N):
        sel = (times >= params["mask_times"][i]).astype(jnp.float32)
        data_loglik = data_loglik + jnp.sum(sel[:, None, None] * lp)
    return -data_loglik, res


if __name__ == "__main__":
    # small shapes: num_time=16, num_subj=4, num_taxa=8, num_rules=4
    T, S, N, R = 16, 4, 8, 4

    key = jax.random.PRNGKey(0)
    ks = jax.random.split(key, 8)

    times = jnp.arange(T, dtype=jnp.float32) / T
    abundance = jax.random.uniform(ks[0], (T, S, N), jnp.float32)
    gradient = jax.random.normal(ks[1], (T, S, N), jnp.float32)

    # parameter shapes from RuleGradientMatchingModel.__init__; normal init so the
    # eval-mode Bernoulli selectors come out as a mix of 0s and 1s.
    params = {
        "det_q": jax.random.normal(ks[2], (N, R, N), jnp.float32),
        "rule_q": jax.random.normal(ks[3], (N, R), jnp.float32),
        "split_points": jax.random.normal(ks[4], (N, R, N), jnp.float32),
        "log_alpha_default": jax.random.normal(ks[5], (N,), jnp.float32),
        "log_beta": jax.random.normal(ks[6], (N,), jnp.float32),
        "alpha_rules": jax.random.normal(ks[7], (N, R), jnp.float32),
        # mask_times inside the time range so the time-masking path is exercised
        "mask_times": jnp.linspace(-1.0, 0.6, N).astype(jnp.float32),
        "data_variance": jnp.asarray(0.5, jnp.float32),   # empirical_variance (learn_variance=False)
        "split_temp": jnp.asarray(1.0, jnp.float32),      # split_start_temp at epoch 0
    }
    # set_params_from_data
    minval = jnp.min(abundance, axis=(0, 1))
    maxval = jnp.max(abundance, axis=(0, 1))
    params["min_range"] = minval
    params["mrange"] = maxval - minval

    loss, res = rule_forward(times, abundance, gradient, params)
    loss = jax.block_until_ready(loss)
    res = jax.block_until_ready(res)

    loss_ref, res_ref = rule_forward_ref(times, abundance, gradient, params)

    assert jnp.allclose(res, res_ref, rtol=1e-5, atol=1e-4), "res mismatch"
    assert jnp.allclose(loss, loss_ref, rtol=1e-5, atol=1e-3), "loss mismatch"

    print("KERNEL_OK")
</pallas_src>

<mosaic_0001>
module attributes {stable_mosaic.version = 11 : i64} {
  func.func @rule_kernel(%arg0: i32, %arg1: memref<10x128xf32, #tpu.memory_space<vmem>>, %arg2: memref<8x128xf32, #tpu.memory_space<vmem>>, %arg3: memref<5x8x1xf32, #tpu.memory_space<vmem>>, %arg4: memref<8x32x1xf32, #tpu.memory_space<vmem>>, %arg5: memref<8x32x1xf32, #tpu.memory_space<vmem>>, %arg6: memref<32x1xf32, #tpu.memory_space<vmem>>, %arg7: memref<8x128xf32, #tpu.memory_space<vmem>>, %arg8: memref<1x1xf32, #tpu.memory_space<smem>>, %arg9: memref<8x128xf32, #tpu.memory_space<vmem>>) attributes {dimension_semantics = [#tpu.dimension_semantics<arbitrary>], iteration_bounds = array<i64: 1>, scalar_prefetch = 0 : i64, scratch_operands = 1 : i64, tpu.core_type = #tpu.core_type<tc>, window_params = [{transform_indices = @transform_0, window_bounds = array<i64: 10, 128>}, {transform_indices = @transform_1, window_bounds = array<i64: 8, 128>}, {pipeline_mode = #tpu.pipeline_mode<synchronous>, transform_indices = @transform_2, window_bounds = array<i64: 5, 8, 1>}, {pipeline_mode = #tpu.pipeline_mode<synchronous>, transform_indices = @transform_3, window_bounds = array<i64: 8, 32, 1>}, {pipeline_mode = #tpu.pipeline_mode<synchronous>, transform_indices = @transform_4, window_bounds = array<i64: 8, 32, 1>}, {pipeline_mode = #tpu.pipeline_mode<synchronous>, transform_indices = @transform_5, window_bounds = array<i64: 32, 1>}, {transform_indices = @transform_6, window_bounds = array<i64: 8, 128>}, {transform_indices = @transform_7, window_bounds = array<i64: 1, 1>}]} {
    %c0 = arith.constant 0 : index
    %c0_0 = arith.constant 0 : index
    %0 = vector.load %arg1[%c0, %c0_0] : memref<10x128xf32, #tpu.memory_space<vmem>>, vector<10x128xf32>
    %c0_1 = arith.constant 0 : index
    %c0_2 = arith.constant 0 : index
    %1 = vector.load %arg2[%c0_1, %c0_2] : memref<8x128xf32, #tpu.memory_space<vmem>>, vector<8x128xf32>
    %c0_3 = arith.constant 0 : index
    %c0_4 = arith.constant 0 : index
    %2 = vector.load %arg6[%c0_3, %c0_4] : memref<32x1xf32, #tpu.memory_space<vmem>>, vector<32x1xf32>
    %3 = vector.extract_strided_slice %0 {offsets = [0, 0], sizes = [8, 128], strides = [1, 1]} : vector<10x128xf32> to vector<8x128xf32>
    %4 = vector.extract_strided_slice %0 {offsets = [8, 0], sizes = [1, 128], strides = [1, 1]} : vector<10x128xf32> to vector<1x128xf32>
    %5 = vector.extract_strided_slice %0 {offsets = [9, 0], sizes = [1, 128], strides = [1, 1]} : vector<10x128xf32> to vector<1x128xf32>
    %c0_5 = arith.constant 0 : index
    %c0_6 = arith.constant 0 : index
    %c0_7 = arith.constant 0 : index
    %6 = vector.load %arg3[%c0_5, %c0_6, %c0_7] : memref<5x8x1xf32, #tpu.memory_space<vmem>>, vector<1x8x1xf32>
    %7 = vector.shape_cast %6 : vector<1x8x1xf32> to vector<8x1xf32>
    %c1 = arith.constant 1 : index
    %c0_8 = arith.constant 0 : index
    %c0_9 = arith.constant 0 : index
    %8 = vector.load %arg3[%c1, %c0_8, %c0_9] : memref<5x8x1xf32, #tpu.memory_space<vmem>>, vector<1x8x1xf32>
    %9 = vector.shape_cast %8 : vector<1x8x1xf32> to vector<8x1xf32>
    %c2 = arith.constant 2 : index
    %c0_10 = arith.constant 0 : index
    %c0_11 = arith.constant 0 : index
    %10 = vector.load %arg3[%c2, %c0_10, %c0_11] : memref<5x8x1xf32, #tpu.memory_space<vmem>>, vector<1x8x1xf32>
    %11 = vector.shape_cast %10 : vector<1x8x1xf32> to vector<8x1xf32>
    %c3 = arith.constant 3 : index
    %c0_12 = arith.constant 0 : index
    %c0_13 = arith.constant 0 : index
    %12 = vector.load %arg3[%c3, %c0_12, %c0_13] : memref<5x8x1xf32, #tpu.memory_space<vmem>>, vector<1x8x1xf32>
    %13 = vector.shape_cast %12 : vector<1x8x1xf32> to vector<8x1xf32>
    %c4 = arith.constant 4 : index
    %c0_14 = arith.constant 0 : index
    %c0_15 = arith.constant 0 : index
    %14 = vector.load %arg3[%c4, %c0_14, %c0_15] : memref<5x8x1xf32, #tpu.memory_space<vmem>>, vector<1x8x1xf32>
    %15 = vector.shape_cast %14 : vector<1x8x1xf32> to vector<8x1xf32>
    %16 = vector.broadcast %4 : vector<1x128xf32> to vector<8x128xf32>
    %17 = vector.broadcast %7 : vector<8x1xf32> to vector<8x128xf32>
    %18 = arith.cmpf oge, %16, %17 : vector<8x128xf32>
    %19 = arith.extui %18 : vector<8x128xi1> to vector<8x128xi32>
    %20 = arith.sitofp %19 : vector<8x128xi32> to vector<8x128xf32>
    %21 = vector.broadcast %9 : vector<8x1xf32> to vector<8x128xf32>
    %22 = arith.subf %3, %21 : vector<8x128xf32>
    %23 = vector.broadcast %11 : vector<8x1xf32> to vector<8x128xf32>
    %24 = arith.mulf %22, %23 : vector<8x128xf32>
    %25 = vector.extract_strided_slice %24 {offsets = [0, 0], sizes = [1, 128], strides = [1, 1]} : vector<8x128xf32> to vector<1x128xf32>
    %26 = vector.extract_strided_slice %20 {offsets = [0, 0], sizes = [1, 128], strides = [1, 1]} : vector<8x128xf32> to vector<1x128xf32>
    %c0_16 = arith.constant 0 : index
    %c0_17 = arith.constant 0 : index
    %c0_18 = arith.constant 0 : index
    %27 = vector.load %arg4[%c0_16, %c0_17, %c0_18] : memref<8x32x1xf32, #tpu.memory_space<vmem>>, vector<1x32x1xf32>
    %28 = vector.shape_cast %27 : vector<1x32x1xf32> to vector<32x1xf32>
    %c0_19 = arith.constant 0 : index
    %c0_20 = arith.constant 0 : index
    %c0_21 = arith.constant 0 : index
    %29 = vector.load %arg5[%c0_19, %c0_20, %c0_21] : memref<8x32x1xf32, #tpu.memory_space<vmem>>, vector<1x32x1xf32>
    %30 = vector.shape_cast %29 : vector<1x32x1xf32> to vector<32x1xf32>
    %31 = vector.broadcast %25 : vector<1x128xf32> to vector<32x128xf32>
    %32 = vector.broadcast %28 : vector<32x1xf32> to vector<32x128xf32>
    %33 = arith.subf %31, %32 : vector<32x128xf32>
    %cst = arith.constant 5.000000e-01 : f32
    %34 = vector.broadcast %cst : f32 to vector<32x128xf32>
    %35 = arith.mulf %34, %33 : vector<32x128xf32>
    %36 = math.tanh %35 : vector<32x128xf32>
    %cst_22 = arith.constant 5.000000e-01 : f32
    %37 = vector.broadcast %cst_22 : f32 to vector<32x128xf32>
    %38 = arith.mulf %37, %36 : vector<32x128xf32>
    %cst_23 = arith.constant 5.000000e-01 : f32
    %39 = vector.broadcast %cst_23 : f32 to vector<32x128xf32>
    %40 = arith.addf %38, %39 : vector<32x128xf32>
    %41 = vector.broadcast %26 : vector<1x128xf32> to vector<32x128xf32>
    %42 = arith.mulf %40, %41 : vector<32x128xf32>
    %cst_24 = arith.constant 1.000000e+00 : f32
    %43 = vector.broadcast %cst_24 : f32 to vector<32x128xf32>
    %44 = arith.subf %43, %42 : vector<32x128xf32>
    %45 = vector.broadcast %30 : vector<32x1xf32> to vector<32x128xf32>
    %46 = arith.mulf %45, %44 : vector<32x128xf32>
    %cst_25 = arith.constant 1.000000e+00 : f32
    %47 = vector.broadcast %cst_25 : f32 to vector<32x128xf32>
    %48 = arith.subf %47, %46 : vector<32x128xf32>
    %49 = vector.extract_strided_slice %24 {offsets = [1, 0], sizes = [1, 128], strides = [1, 1]} : vector<8x128xf32> to vector<1x128xf32>
    %50 = vector.extract_strided_slice %20 {offsets = [1, 0], sizes = [1, 128], strides = [1, 1]} : vector<8x128xf32> to vector<1x128xf32>
    %c1_26 = arith.constant 1 : index
    %c0_27 = arith.constant 0 : index
    %c0_28 = arith.constant 0 : index
    %51 = vector.load %arg4[%c1_26, %c0_27, %c0_28] : memref<8x32x1xf32, #tpu.memory_space<vmem>>, vector<1x32x1xf32>
    %52 = vector.shape_cast %51 : vector<1x32x1xf32> to vector<32x1xf32>
    %c1_29 = arith.constant 1 : index
    %c0_30 = arith.constant 0 : index
    %c0_31 = arith.constant 0 : index
    %53 = vector.load %arg5[%c1_29, %c0_30, %c0_31] : memref<8x32x1xf32, #tpu.memory_space<vmem>>, vector<1x32x1xf32>
    %54 = vector.shape_cast %53 : vector<1x32x1xf32> to vector<32x1xf32>
    %55 = vector.broadcast %49 : vector<1x128xf32> to vector<32x128xf32>
    %56 = vector.broadcast %52 : vector<32x1xf32> to vector<32x128xf32>
    %57 = arith.subf %55, %56 : vector<32x128xf32>
    %cst_32 = arith.constant 5.000000e-01 : f32
    %58 = vector.broadcast %cst_32 : f32 to vector<32x128xf32>
    %59 = arith.mulf %58, %57 : vector<32x128xf32>
    %60 = math.tanh %59 : vector<32x128xf32>
    %cst_33 = arith.constant 5.000000e-01 : f32
    %61 = vector.broadcast %cst_33 : f32 to vector<32x128xf32>
    %62 = arith.mulf %61, %60 : vector<32x128xf32>
    %cst_34 = arith.constant 5.000000e-01 : f32
    %63 = vector.broadcast %cst_34 : f32 to vector<32x128xf32>
    %64 = arith.addf %62, %63 : vector<32x128xf32>
    %65 = vector.broadcast %50 : vector<1x128xf32> to vector<32x128xf32>
    %66 = arith.mulf %64, %65 : vector<32x128xf32>
    %cst_35 = arith.constant 1.000000e+00 : f32
    %67 = vector.broadcast %cst_35 : f32 to vector<32x128xf32>
    %68 = arith.subf %67, %66 : vector<32x128xf32>
    %69 = vector.broadcast %54 : vector<32x1xf32> to vector<32x128xf32>
    %70 = arith.mulf %69, %68 : vector<32x128xf32>
    %cst_36 = arith.constant 1.000000e+00 : f32
    %71 = vector.broadcast %cst_36 : f32 to vector<32x128xf32>
    %72 = arith.subf %71, %70 : vector<32x128xf32>
    %73 = arith.mulf %48, %72 : vector<32x128xf32>
    %74 = vector.extract_strided_slice %24 {offsets = [2, 0], sizes = [1, 128], strides = [1, 1]} : vector<8x128xf32> to vector<1x128xf32>
    %75 = vector.extract_strided_slice %20 {offsets = [2, 0], sizes = [1, 128], strides = [1, 1]} : vector<8x128xf32> to vector<1x128xf32>
    %c2_37 = arith.constant 2 : index
    %c0_38 = arith.constant 0 : index
    %c0_39 = arith.constant 0 : index
    %76 = vector.load %arg4[%c2_37, %c0_38, %c0_39] : memref<8x32x1xf32, #tpu.memory_space<vmem>>, vector<1x32x1xf32>
    %77 = vector.shape_cast %76 : vector<1x32x1xf32> to vector<32x1xf32>
    %c2_40 = arith.constant 2 : index
    %c0_41 = arith.constant 0 : index
    %c0_42 = arith.constant 0 : index
    %78 = vector.load %arg5[%c2_40, %c0_41, %c0_42] : memref<8x32x1xf32, #tpu.memory_space<vmem>>, vector<1x32x1xf32>
    %79 = vector.shape_cast %78 : vector<1x32x1xf32> to vector<32x1xf32>
    %80 = vector.broadcast %74 : vector<1x128xf32> to vector<32x128xf32>
    %81 = vector.broadcast %77 : vector<32x1xf32> to vector<32x128xf32>
    %82 = arith.subf %80, %81 : vector<32x128xf32>
    %cst_43 = arith.constant 5.000000e-01 : f32
    %83 = vector.broadcast %cst_43 : f32 to vector<32x128xf32>
    %84 = arith.mulf %83, %82 : vector<32x128xf32>
    %85 = math.tanh %84 : vector<32x128xf32>
    %cst_44 = arith.constant 5.000000e-01 : f32
    %86 = vector.broadcast %cst_44 : f32 to vector<32x128xf32>
    %87 = arith.mulf %86, %85 : vector<32x128xf32>
    %cst_45 = arith.constant 5.000000e-01 : f32
    %88 = vector.broadcast %cst_45 : f32 to vector<32x128xf32>
    %89 = arith.addf %87, %88 : vector<32x128xf32>
    %90 = vector.broadcast %75 : vector<1x128xf32> to vector<32x128xf32>
    %91 = arith.mulf %89, %90 : vector<32x128xf32>
    %cst_46 = arith.constant 1.000000e+00 : f32
    %92 = vector.broadcast %cst_46 : f32 to vector<32x128xf32>
    %93 = arith.subf %92, %91 : vector<32x128xf32>
    %94 = vector.broadcast %79 : vector<32x1xf32> to vector<32x128xf32>
    %95 = arith.mulf %94, %93 : vector<32x128xf32>
    %cst_47 = arith.constant 1.000000e+00 : f32
    %96 = vector.broadcast %cst_47 : f32 to vector<32x128xf32>
    %97 = arith.subf %96, %95 : vector<32x128xf32>
    %98 = arith.mulf %73, %97 : vector<32x128xf32>
    %99 = vector.extract_strided_slice %24 {offsets = [3, 0], sizes = [1, 128], strides = [1, 1]} : vector<8x128xf32> to vector<1x128xf32>
    %100 = vector.extract_strided_slice %20 {offsets = [3, 0], sizes = [1, 128], strides = [1, 1]} : vector<8x128xf32> to vector<1x128xf32>
    %c3_48 = arith.constant 3 : index
    %c0_49 = arith.constant 0 : index
    %c0_50 = arith.constant 0 : index
    %101 = vector.load %arg4[%c3_48, %c0_49, %c0_50] : memref<8x32x1xf32, #tpu.memory_space<vmem>>, vector<1x32x1xf32>
    %102 = vector.shape_cast %101 : vector<1x32x1xf32> to vector<32x1xf32>
    %c3_51 = arith.constant 3 : index
    %c0_52 = arith.constant 0 : index
    %c0_53 = arith.constant 0 : index
    %103 = vector.load %arg5[%c3_51, %c0_52, %c0_53] : memref<8x32x1xf32, #tpu.memory_space<vmem>>, vector<1x32x1xf32>
    %104 = vector.shape_cast %103 : vector<1x32x1xf32> to vector<32x1xf32>
    %105 = vector.broadcast %99 : vector<1x128xf32> to vector<32x128xf32>
    %106 = vector.broadcast %102 : vector<32x1xf32> to vector<32x128xf32>
    %107 = arith.subf %105, %106 : vector<32x128xf32>
    %cst_54 = arith.constant 5.000000e-01 : f32
    %108 = vector.broadcast %cst_54 : f32 to vector<32x128xf32>
    %109 = arith.mulf %108, %107 : vector<32x128xf32>
    %110 = math.tanh %109 : vector<32x128xf32>
    %cst_55 = arith.constant 5.000000e-01 : f32
    %111 = vector.broadcast %cst_55 : f32 to vector<32x128xf32>
    %112 = arith.mulf %111, %110 : vector<32x128xf32>
    %cst_56 = arith.constant 5.000000e-01 : f32
    %113 = vector.broadcast %cst_56 : f32 to vector<32x128xf32>
    %114 = arith.addf %112, %113 : vector<32x128xf32>
    %115 = vector.broadcast %100 : vector<1x128xf32> to vector<32x128xf32>
    %116 = arith.mulf %114, %115 : vector<32x128xf32>
    %cst_57 = arith.constant 1.000000e+00 : f32
    %117 = vector.broadcast %cst_57 : f32 to vector<32x128xf32>
    %118 = arith.subf %117, %116 : vector<32x128xf32>
    %119 = vector.broadcast %104 : vector<32x1xf32> to vector<32x128xf32>
    %120 = arith.mulf %119, %118 : vector<32x128xf32>
    %cst_58 = arith.constant 1.000000e+00 : f32
    %121 = vector.broadcast %cst_58 : f32 to vector<32x128xf32>
    %122 = arith.subf %121, %120 : vector<32x128xf32>
    %123 = arith.mulf %98, %122 : vector<32x128xf32>
    %124 = vector.extract_strided_slice %24 {offsets = [4, 0], sizes = [1, 128], strides = [1, 1]} : vector<8x128xf32> to vector<1x128xf32>
    %125 = vector.extract_strided_slice %20 {offsets = [4, 0], sizes = [1, 128], strides = [1, 1]} : vector<8x128xf32> to vector<1x128xf32>
    %c4_59 = arith.constant 4 : index
    %c0_60 = arith.constant 0 : index
    %c0_61 = arith.constant 0 : index
    %126 = vector.load %arg4[%c4_59, %c0_60, %c0_61] : memref<8x32x1xf32, #tpu.memory_space<vmem>>, vector<1x32x1xf32>
    %127 = vector.shape_cast %126 : vector<1x32x1xf32> to vector<32x1xf32>
    %c4_62 = arith.constant 4 : index
    %c0_63 = arith.constant 0 : index
    %c0_64 = arith.constant 0 : index
    %128 = vector.load %arg5[%c4_62, %c0_63, %c0_64] : memref<8x32x1xf32, #tpu.memory_space<vmem>>, vector<1x32x1xf32>
    %129 = vector.shape_cast %128 : vector<1x32x1xf32> to vector<32x1xf32>
    %130 = vector.broadcast %124 : vector<1x128xf32> to vector<32x128xf32>
    %131 = vector.broadcast %127 : vector<32x1xf32> to vector<32x128xf32>
    %132 = arith.subf %130, %131 : vector<32x128xf32>
    %cst_65 = arith.constant 5.000000e-01 : f32
    %133 = vector.broadcast %cst_65 : f32 to vector<32x128xf32>
    %134 = arith.mulf %133, %132 : vector<32x128xf32>
    %135 = math.tanh %134 : vector<32x128xf32>
    %cst_66 = arith.constant 5.000000e-01 : f32
    %136 = vector.broadcast %cst_66 : f32 to vector<32x128xf32>
    %137 = arith.mulf %136, %135 : vector<32x128xf32>
    %cst_67 = arith.constant 5.000000e-01 : f32
    %138 = vector.broadcast %cst_67 : f32 to vector<32x128xf32>
    %139 = arith.addf %137, %138 : vector<32x128xf32>
    %140 = vector.broadcast %125 : vector<1x128xf32> to vector<32x128xf32>
    %141 = arith.mulf %139, %140 : vector<32x128xf32>
    %cst_68 = arith.constant 1.000000e+00 : f32
    %142 = vector.broadcast %cst_68 : f32 to vector<32x128xf32>
    %143 = arith.subf %142, %141 : vector<32x128xf32>
    %144 = vector.broadcast %129 : vector<32x1xf32> to vector<32x128xf32>
    %145 = arith.mulf %144, %143 : vector<32x128xf32>
    %cst_69 = arith.constant 1.000000e+00 : f32
    %146 = vector.broadcast %cst_69 : f32 to vector<32x128xf32>
    %147 = arith.subf %146, %145 : vector<32x128xf32>
    %148 = arith.mulf %123, %147 : vector<32x128xf32>
    %149 = vector.extract_strided_slice %24 {offsets = [5, 0], sizes = [1, 128], strides = [1, 1]} : vector<8x128xf32> to vector<1x128xf32>
    %150 = vector.extract_strided_slice %20 {offsets = [5, 0], sizes = [1, 128], strides = [1, 1]} : vector<8x128xf32> to vector<1x128xf32>
    %c5 = arith.constant 5 : index
    %c0_70 = arith.constant 0 : index
    %c0_71 = arith.constant 0 : index
    %151 = vector.load %arg4[%c5, %c0_70, %c0_71] : memref<8x32x1xf32, #tpu.memory_space<vmem>>, vector<1x32x1xf32>
    %152 = vector.shape_cast %151 : vector<1x32x1xf32> to vector<32x1xf32>
    %c5_72 = arith.constant 5 : index
    %c0_73 = arith.constant 0 : index
    %c0_74 = arith.constant 0 : index
    %153 = vector.load %arg5[%c5_72, %c0_73, %c0_74] : memref<8x32x1xf32, #tpu.memory_space<vmem>>, vector<1x32x1xf32>
    %154 = vector.shape_cast %153 : vector<1x32x1xf32> to vector<32x1xf32>
    %155 = vector.broadcast %149 : vector<1x128xf32> to vector<32x128xf32>
    %156 = vector.broadcast %152 : vector<32x1xf32> to vector<32x128xf32>
    %157 = arith.subf %155, %156 : vector<32x128xf32>
    %cst_75 = arith.constant 5.000000e-01 : f32
    %158 = vector.broadcast %cst_75 : f32 to vector<32x128xf32>
    %159 = arith.mulf %158, %157 : vector<32x128xf32>
    %160 = math.tanh %159 : vector<32x128xf32>
    %cst_76 = arith.constant 5.000000e-01 : f32
    %161 = vector.broadcast %cst_76 : f32 to vector<32x128xf32>
    %162 = arith.mulf %161, %160 : vector<32x128xf32>
    %cst_77 = arith.constant 5.000000e-01 : f32
    %163 = vector.broadcast %cst_77 : f32 to vector<32x128xf32>
    %164 = arith.addf %162, %163 : vector<32x128xf32>
    %165 = vector.broadcast %150 : vector<1x128xf32> to vector<32x128xf32>
    %166 = arith.mulf %164, %165 : vector<32x128xf32>
    %cst_78 = arith.constant 1.000000e+00 : f32
    %167 = vector.broadcast %cst_78 : f32 to vector<32x128xf32>
    %168 = arith.subf %167, %166 : vector<32x128xf32>
    %169 = vector.broadcast %154 : vector<32x1xf32> to vector<32x128xf32>
    %170 = arith.mulf %169, %168 : vector<32x128xf32>
    %cst_79 = arith.constant 1.000000e+00 : f32
    %171 = vector.broadcast %cst_79 : f32 to vector<32x128xf32>
    %172 = arith.subf %171, %170 : vector<32x128xf32>
    %173 = arith.mulf %148, %172 : vector<32x128xf32>
    %174 = vector.extract_strided_slice %24 {offsets = [6, 0], sizes = [1, 128], strides = [1, 1]} : vector<8x128xf32> to vector<1x128xf32>
    %175 = vector.extract_strided_slice %20 {offsets = [6, 0], sizes = [1, 128], strides = [1, 1]} : vector<8x128xf32> to vector<1x128xf32>
    %c6 = arith.constant 6 : index
    %c0_80 = arith.constant 0 : index
    %c0_81 = arith.constant 0 : index
    %176 = vector.load %arg4[%c6, %c0_80, %c0_81] : memref<8x32x1xf32, #tpu.memory_space<vmem>>, vector<1x32x1xf32>
    %177 = vector.shape_cast %176 : vector<1x32x1xf32> to vector<32x1xf32>
    %c6_82 = arith.constant 6 : index
    %c0_83 = arith.constant 0 : index
    %c0_84 = arith.constant 0 : index
    %178 = vector.load %arg5[%c6_82, %c0_83, %c0_84] : memref<8x32x1xf32, #tpu.memory_space<vmem>>, vector<1x32x1xf32>
    %179 = vector.shape_cast %178 : vector<1x32x1xf32> to vector<32x1xf32>
    %180 = vector.broadcast %174 : vector<1x128xf32> to vector<32x128xf32>
    %181 = vector.broadcast %177 : vector<32x1xf32> to vector<32x128xf32>
    %182 = arith.subf %180, %181 : vector<32x128xf32>
    %cst_85 = arith.constant 5.000000e-01 : f32
    %183 = vector.broadcast %cst_85 : f32 to vector<32x128xf32>
    %184 = arith.mulf %183, %182 : vector<32x128xf32>
    %185 = math.tanh %184 : vector<32x128xf32>
    %cst_86 = arith.constant 5.000000e-01 : f32
    %186 = vector.broadcast %cst_86 : f32 to vector<32x128xf32>
    %187 = arith.mulf %186, %185 : vector<32x128xf32>
    %cst_87 = arith.constant 5.000000e-01 : f32
    %188 = vector.broadcast %cst_87 : f32 to vector<32x128xf32>
    %189 = arith.addf %187, %188 : vector<32x128xf32>
    %190 = vector.broadcast %175 : vector<1x128xf32> to vector<32x128xf32>
    %191 = arith.mulf %189, %190 : vector<32x128xf32>
    %cst_88 = arith.constant 1.000000e+00 : f32
    %192 = vector.broadcast %cst_88 : f32 to vector<32x128xf32>
    %193 = arith.subf %192, %191 : vector<32x128xf32>
    %194 = vector.broadcast %179 : vector<32x1xf32> to vector<32x128xf32>
    %195 = arith.mulf %194, %193 : vector<32x128xf32>
    %cst_89 = arith.constant 1.000000e+00 : f32
    %196 = vector.broadcast %cst_89 : f32 to vector<32x128xf32>
    %197 = arith.subf %196, %195 : vector<32x128xf32>
    %198 = arith.mulf %173, %197 : vector<32x128xf32>
    %199 = vector.extract_strided_slice %24 {offsets = [7, 0], sizes = [1, 128], strides = [1, 1]} : vector<8x128xf32> to vector<1x128xf32>
    %200 = vector.extract_strided_slice %20 {offsets = [7, 0], sizes = [1, 128], strides = [1, 1]} : vector<8x128xf32> to vector<1x128xf32>
    %c7 = arith.constant 7 : index
    %c0_90 = arith.constant 0 : index
    %c0_91 = arith.constant 0 : index
    %201 = vector.load %arg4[%c7, %c0_90, %c0_91] : memref<8x32x1xf32, #tpu.memory_space<vmem>>, vector<1x32x1xf32>
    %202 = vector.shape_cast %201 : vector<1x32x1xf32> to vector<32x1xf32>
    %c7_92 = arith.constant 7 : index
    %c0_93 = arith.constant 0 : index
    %c0_94 = arith.constant 0 : index
    %203 = vector.load %arg5[%c7_92, %c0_93, %c0_94] : memref<8x32x1xf32, #tpu.memory_space<vmem>>, vector<1x32x1xf32>
    %204 = vector.shape_cast %203 : vector<1x32x1xf32> to vector<32x1xf32>
    %205 = vector.broadcast %199 : vector<1x128xf32> to vector<32x128xf32>
    %206 = vector.broadcast %202 : vector<32x1xf32> to vector<32x128xf32>
    %207 = arith.subf %205, %206 : vector<32x128xf32>
    %cst_95 = arith.constant 5.000000e-01 : f32
    %208 = vector.broadcast %cst_95 : f32 to vector<32x128xf32>
    %209 = arith.mulf %208, %207 : vector<32x128xf32>
    %210 = math.tanh %209 : vector<32x128xf32>
    %cst_96 = arith.constant 5.000000e-01 : f32
    %211 = vector.broadcast %cst_96 : f32 to vector<32x128xf32>
    %212 = arith.mulf %211, %210 : vector<32x128xf32>
    %cst_97 = arith.constant 5.000000e-01 : f32
    %213 = vector.broadcast %cst_97 : f32 to vector<32x128xf32>
    %214 = arith.addf %212, %213 : vector<32x128xf32>
    %215 = vector.broadcast %200 : vector<1x128xf32> to vector<32x128xf32>
    %216 = arith.mulf %214, %215 : vector<32x128xf32>
    %cst_98 = arith.constant 1.000000e+00 : f32
    %217 = vector.broadcast %cst_98 : f32 to vector<32x128xf32>
    %218 = arith.subf %217, %216 : vector<32x128xf32>
    %219 = vector.broadcast %204 : vector<32x1xf32> to vector<32x128xf32>
    %220 = arith.mulf %219, %218 : vector<32x128xf32>
    %cst_99 = arith.constant 1.000000e+00 : f32
    %221 = vector.broadcast %cst_99 : f32 to vector<32x128xf32>
    %222 = arith.subf %221, %220 : vector<32x128xf32>
    %223 = arith.mulf %198, %222 : vector<32x128xf32>
    %224 = vector.broadcast %2 : vector<32x1xf32> to vector<32x128xf32>
    %225 = arith.mulf %223, %224 : vector<32x128xf32>
    %226 = vector.extract_strided_slice %225 {offsets = [0, 0], sizes = [8, 128], strides = [1, 1]} : vector<32x128xf32> to vector<8x128xf32>
    %227 = vector.extract_strided_slice %225 {offsets = [8, 0], sizes = [8, 128], strides = [1, 1]} : vector<32x128xf32> to vector<8x128xf32>
    %228 = arith.addf %226, %227 : vector<8x128xf32>
    %229 = vector.extract_strided_slice %225 {offsets = [16, 0], sizes = [8, 128], strides = [1, 1]} : vector<32x128xf32> to vector<8x128xf32>
    %230 = arith.addf %228, %229 : vector<8x128xf32>
    %231 = vector.extract_strided_slice %225 {offsets = [24, 0], sizes = [8, 128], strides = [1, 1]} : vector<32x128xf32> to vector<8x128xf32>
    %232 = arith.addf %230, %231 : vector<8x128xf32>
    %233 = vector.broadcast %13 : vector<8x1xf32> to vector<8x128xf32>
    %234 = arith.addf %232, %233 : vector<8x128xf32>
    %235 = vector.broadcast %15 : vector<8x1xf32> to vector<8x128xf32>
    %236 = arith.mulf %235, %3 : vector<8x128xf32>
    %237 = arith.subf %234, %236 : vector<8x128xf32>
    %238 = arith.mulf %237, %20 : vector<8x128xf32>
    %c0_100 = arith.constant 0 : index
    %c0_101 = arith.constant 0 : index
    %239 = vector.load %arg7[%c0_100, %c0_101] : memref<8x128xf32, #tpu.memory_space<vmem>>, vector<8x128xf32>
    tpu.vector_store %arg7[%c0_100, %c0_101], %238 {strides = array<i32>} : memref<8x128xf32, #tpu.memory_space<vmem>>, vector<8x128xf32>,
    %240 = arith.subf %238, %1 : vector<8x128xf32>
    %c0_i32 = arith.constant 0 : i32
    %241 = arith.cmpi eq, %arg0, %c0_i32 : i32
    %242 = arith.extui %241 : i1 to i32
    %c0_i32_102 = arith.constant 0 : i32
    %243 = arith.cmpi ne, %242, %c0_i32_102 : i32
    scf.if %243 {
      %cst_109 = arith.constant 0.000000e+00 : f32
      %253 = vector.broadcast %cst_109 : f32 to vector<8x128xf32>
      %c0_110 = arith.constant 0 : index
      %c0_111 = arith.constant 0 : index
      %254 = vector.load %arg9[%c0_110, %c0_111] : memref<8x128xf32, #tpu.memory_space<vmem>>, vector<8x128xf32>
      tpu.vector_store %arg9[%c0_110, %c0_111], %253 {strides = array<i32>} : memref<8x128xf32, #tpu.memory_space<vmem>>, vector<8x128xf32>,
    } else {
    }
    %c0_103 = arith.constant 0 : index
    %c0_104 = arith.constant 0 : index
    %244 = vector.load %arg9[%c0_103, %c0_104] : memref<8x128xf32, #tpu.memory_space<vmem>>, vector<8x128xf32>
    %245 = arith.mulf %240, %240 : vector<8x128xf32>
    %246 = vector.broadcast %5 : vector<1x128xf32> to vector<8x128xf32>
    %247 = arith.mulf %245, %246 : vector<8x128xf32>
    %248 = arith.addf %244, %247 : vector<8x128xf32>
    %c0_105 = arith.constant 0 : index
    %c0_106 = arith.constant 0 : index
    %249 = vector.load %arg9[%c0_105, %c0_106] : memref<8x128xf32, #tpu.memory_space<vmem>>, vector<8x128xf32>
    tpu.vector_store %arg9[%c0_105, %c0_106], %248 {strides = array<i32>} : memref<8x128xf32, #tpu.memory_space<vmem>>, vector<8x128xf32>,
    %c0_i32_107 = arith.constant 0 : i32
    %250 = arith.cmpi eq, %arg0, %c0_i32_107 : i32
    %251 = arith.extui %250 : i1 to i32
    %c0_i32_108 = arith.constant 0 : i32
    %252 = arith.cmpi ne, %251, %c0_i32_108 : i32
    scf.if %252 {
      %c0_109 = arith.constant 0 : index
      %c0_110 = arith.constant 0 : index
      %253 = vector.load %arg9[%c0_109, %c0_110] : memref<8x128xf32, #tpu.memory_space<vmem>>, vector<8x128xf32>
      %254 = vector.shape_cast %253 : vector<8x128xf32> to vector<1x8x128xf32>
      %cst_111 = arith.constant dense<0.000000e+00> : vector<1xf32>
      %255 = vector.multi_reduction <add>, %254, %cst_111 [1, 2] : vector<1x8x128xf32> to vector<1xf32>
      %256 = vector.shape_cast %255 : vector<1xf32> to vector<1x1x1xf32>
      %257 = vector.extract %256[0, 0, 0] : f32 from vector<1x1x1xf32>
      %c0_112 = arith.constant 0 : index
      %c0_113 = arith.constant 0 : index
      %258 = memref.load %arg8[%c0_112, %c0_113] : memref<1x1xf32, #tpu.memory_space<smem>>
      memref.store %257, %arg8[%c0_112, %c0_113] : memref<1x1xf32, #tpu.memory_space<smem>>
    } else {
    }
    return
  }
  func.func @transform_0(%arg0: i32) -> (i32, i32) {
    %c0_i32 = arith.constant 0 : i32
    %c0_i32_0 = arith.constant 0 : i32
    return %c0_i32, %arg0 : i32, i32
  }
  func.func @transform_1(%arg0: i32) -> (i32, i32) {
    %c0_i32 = arith.constant 0 : i32
    %c0_i32_0 = arith.constant 0 : i32
    return %c0_i32, %arg0 : i32, i32
  }
  func.func @transform_2(%arg0: i32) -> (i32, i32, i32) {
    %c0_i32 = arith.constant 0 : i32
    %c0_i32_0 = arith.constant 0 : i32
    %c0_i32_1 = arith.constant 0 : i32
    %c0_i32_2 = arith.constant 0 : i32
    return %c0_i32, %c0_i32_0, %c0_i32_1 : i32, i32, i32
  }
  func.func @transform_3(%arg0: i32) -> (i32, i32, i32) {
    %c0_i32 = arith.constant 0 : i32
    %c0_i32_0 = arith.constant 0 : i32
    %c0_i32_1 = arith.constant 0 : i32
    %c0_i32_2 = arith.constant 0 : i32
    return %c0_i32, %c0_i32_0, %c0_i32_1 : i32, i32, i32
  }
  func.func @transform_4(%arg0: i32) -> (i32, i32, i32) {
    %c0_i32 = arith.constant 0 : i32
    %c0_i32_0 = arith.constant 0 : i32
    %c0_i32_1 = arith.constant 0 : i32
    %c0_i32_2 = arith.constant 0 : i32
    return %c0_i32, %c0_i32_0, %c0_i32_1 : i32, i32, i32
  }
  func.func @transform_5(%arg0: i32) -> (i32, i32) {
    %c0_i32 = arith.constant 0 : i32
    %c0_i32_0 = arith.constant 0 : i32
    %c0_i32_1 = arith.constant 0 : i32
    return %c0_i32, %c0_i32_0 : i32, i32
  }
  func.func @transform_6(%arg0: i32) -> (i32, i32) {
    %c0_i32 = arith.constant 0 : i32
    %c0_i32_0 = arith.constant 0 : i32
    return %c0_i32, %arg0 : i32, i32
  }
  func.func @transform_7(%arg0: i32) -> (i32, i32) {
    %c0_i32 = arith.constant 0 : i32
    %c0_i32_0 = arith.constant 0 : i32
    %c0_i32_1 = arith.constant 0 : i32
    return %c0_i32, %c0_i32_0 : i32, i32
  }
}

</mosaic_0001>

<bundles_post_ra>
// kernel: _rule_forward.1
= control target key start
LH: loop header
LB: loop body
LE: loop exit
PB: predicated region body
PF: predicated region fallthrough
CT: control target
= control target key end

     0   :  { %v1077_v2 = vmov 0   ;;  %s1596_s0 = inlined_call_operand.vmem [shape: f32[10,128], index: 0, kind: input, shape index: {}]   ;;  %s1597_s1 = inlined_call_operand.vmem [shape: f32[8,128], index: 1, kind: input, shape index: {}]   ;;  %s1598_s2 = inlined_call_operand.vmem [shape: f32[5,8,1], index: 2, kind: input, shape index: {}]   ;;  %s1599_s3 = inlined_call_operand.vmem [shape: f32[8,32,1], index: 3, kind: input, shape index: {}]   ;;  %s1600_s4 = inlined_call_operand.vmem [shape: f32[8,32,1], index: 4, kind: input, shape index: {}]   ;;  %s1601_s5 = inlined_call_operand.vmem [shape: f32[32,1], index: 5, kind: input, shape index: {}]   ;;  %s1602_s6 = inlined_call_operand.vmem [shape: f32[8,128], index: 6, kind: output, shape index: {0}]   ;;  %s1603_s7 = inlined_call_operand.hbm [shape: f32[1,1], index: 7, kind: output, shape index: {1}]  }
   0x1   :  { %v934_v0 = vld [vmem:[%s1598_s2 + $0x10] sm:$0xff]  ;;  %v33_v1 = vld [vmem:[%s1598_s2] sm:$0xff]  ;;  %1000 = vset.pattern.permute.xlu1 %v1077_v2  ;;  %999 = vset.pattern.permute.xlu0 %v1077_v2  ;;  %v933_v4 = vld [vmem:[%s1598_s2 + $0x8] sm:$0xff] }
   0x2   :  { %62 = vperm.xlu1 %1000, %v934_v0   ;;  %48 = vperm.xlu0 %999, %v33_v1   ;;  %v66_v3 = vld [vmem:[%s1599_s3] sm:$0xff]  ;;  %v68_v5 = vld [vmem:[%s1599_s3 + $0x10] sm:$0xff]  ;;  %v67_v6 = vld [vmem:[%s1599_s3 + $0x8] sm:$0xff] }
   0x3   :  { %v70_v7 = vld [vmem:[%s1600_s4] sm:$0xff]  ;;  %v69_v8 = vld [vmem:[%s1599_s3 + $0x18] sm:$0xff]  ;;  %v72_v9 = vld [vmem:[%s1600_s4 + $0x10] sm:$0xff] }
   0x4   :  { %v71_v10 = vld [vmem:[%s1600_s4 + $0x8] sm:$0xff]  ;;  %v938_v11 = vld [vmem:[%s1599_s3 + $0x20] sm:$0xff]  ;;  %v73_v12 = vld [vmem:[%s1600_s4 + $0x18] sm:$0xff] }
   0x5   :  { %v940_v13 = vld [vmem:[%s1599_s3 + $0x30] sm:$0xff]  ;;  %v939_v14 = vld [vmem:[%s1599_s3 + $0x28] sm:$0xff] }
   0x6   :  { %80 = vperm.xlu1 %1000, %v66_v3   ;;  %56 = vperm.xlu0 %999, %v933_v4  }
   0xa   :  { %90 = vperm.xlu1 %1000, %v68_v5   ;;  %85 = vperm.xlu0 %999, %v67_v6  }
   0xe   :  { %132 = vperm.xlu1 %1000, %v70_v7   ;;  %95 = vperm.xlu0 %999, %v69_v8  }
  0x12   :  { %142 = vperm.xlu1 %1000, %v72_v9   ;;  %137 = vperm.xlu0 %999, %v71_v10  }
  0x16   :  { %174 = vperm.xlu1 %1000, %v938_v11   ;;  %147 = vperm.xlu0 %999, %v73_v12  }
  0x17   :  { %13 = vsyncpa [#allocation4], 0  ;;  %v947_v15 = vld [vmem:[%s1599_s3 + $0x48] sm:$0xff]  ;;  %v946_v16 = vld [vmem:[%s1599_s3 + $0x40] sm:$0xff]  ;;  %v42_v3 = vlaneseq }
  0x18   :  { %v948_v17 = vld [vmem:[%s1599_s3 + $0x50] sm:$0xff]  ;;  %v941_v18 = vld [vmem:[%s1599_s3 + $0x38] sm:$0xff]  ;;  %v955_v19 = vld [vmem:[%s1599_s3 + $0x68] sm:$0xff] }
  0x19   :  { %v954_v20 = vld [vmem:[%s1599_s3 + $0x60] sm:$0xff]  ;;  %v956_v21 = vld [vmem:[%s1599_s3 + $0x70] sm:$0xff]  ;;  %v949_v22 = vld [vmem:[%s1599_s3 + $0x58] sm:$0xff]  ;;  %v1329_v9 = vshrl.u32 %v42_v3, 7 }
  0x1a   :  { %184 = vperm.xlu1 %1000, %v940_v13   ;;  %179 = vperm.xlu0 %999, %v939_v14   ;;  %v963_v23 = vld [vmem:[%s1599_s3 + $0x88] sm:$0xff]  ;;  %v962_v24 = vld [vmem:[%s1599_s3 + $0x80] sm:$0xff]  ;;  %v964_v25 = vld [vmem:[%s1599_s3 + $0x90] sm:$0xff] }
  0x1b   :  { %v957_v26 = vld [vmem:[%s1599_s3 + $0x78] sm:$0xff]  ;;  %v971_v27 = vld [vmem:[%s1599_s3 + $0xa8] sm:$0xff]  ;;  %v970_v28 = vld [vmem:[%s1599_s3 + $0xa0] sm:$0xff] }
  0x1c   :  { %v972_v29 = vld [vmem:[%s1599_s3 + $0xb0] sm:$0xff]  ;;  %v965_v30 = vld [vmem:[%s1599_s3 + $0x98] sm:$0xff]  ;;  %v979_v31 = vld [vmem:[%s1599_s3 + $0xc8] sm:$0xff] }
  0x1d   :  { %v978_v32 = vld [vmem:[%s1599_s3 + $0xc0] sm:$0xff]  ;;  %v980_v33 = vld [vmem:[%s1599_s3 + $0xd0] sm:$0xff]  ;;  %v973_v34 = vld [vmem:[%s1599_s3 + $0xb8] sm:$0xff] }
  0x1e   :  { %277 = vperm.xlu1 %1000, %v947_v15   ;;  %272 = vperm.xlu0 %999, %v946_v16   ;;  %v987_v35 = vld [vmem:[%s1599_s3 + $0xe8] sm:$0xff]  ;;  %v986_v36 = vld [vmem:[%s1599_s3 + $0xe0] sm:$0xff]  ;;  %v988_v37 = vld [vmem:[%s1599_s3 + $0xf0] sm:$0xff]  ;;  %v44_v15 = vsub.s32 0, %v1329_v9 }
  0x1f   :  { %v981_v38 = vld [vmem:[%s1599_s3 + $0xd8] sm:$0xff]  ;;  %v942_v39 = vld [vmem:[%s1600_s4 + $0x20] sm:$0xff]  ;;  %v944_v41 = vld [vmem:[%s1600_s4 + $0x30] sm:$0xff] }
  0x20   :  { %v989_v40 = vld [vmem:[%s1599_s3 + $0xf8] sm:$0xff]  ;;  %v943_v42 = vld [vmem:[%s1600_s4 + $0x28] sm:$0xff]  ;;  %v950_v44 = vld [vmem:[%s1600_s4 + $0x40] sm:$0xff] }
  0x21   :  { %v951_v43 = vld [vmem:[%s1600_s4 + $0x48] sm:$0xff]  ;;  %v952_v45 = vld [vmem:[%s1600_s4 + $0x50] sm:$0xff]  ;;  %v945_v46 = vld [vmem:[%s1600_s4 + $0x38] sm:$0xff] }
  0x22   :  { %282 = vperm.xlu1 %1000, %v948_v17   ;;  %189 = vperm.xlu0 %999, %v941_v18   ;;  %v959_v47 = vld [vmem:[%s1600_s4 + $0x68] sm:$0xff]  ;;  %v958_v48 = vld [vmem:[%s1600_s4 + $0x60] sm:$0xff]  ;;  %v960_v49 = vld [vmem:[%s1600_s4 + $0x70] sm:$0xff] }
  0x23   :  { %v953_v50 = vld [vmem:[%s1600_s4 + $0x58] sm:$0xff]  ;;  %v967_v51 = vld [vmem:[%s1600_s4 + $0x88] sm:$0xff]  ;;  %v966_v52 = vld [vmem:[%s1600_s4 + $0x80] sm:$0xff] }
  0x24   :  { %v968_v53 = vld [vmem:[%s1600_s4 + $0x90] sm:$0xff]  ;;  %v961_v54 = vld [vmem:[%s1600_s4 + $0x78] sm:$0xff]  ;;  %v975_v55 = vld [vmem:[%s1600_s4 + $0xa8] sm:$0xff] }
  0x25   :  { %v974_v56 = vld [vmem:[%s1600_s4 + $0xa0] sm:$0xff]  ;;  %v976_v57 = vld [vmem:[%s1600_s4 + $0xb0] sm:$0xff]  ;;  %v969_v58 = vld [vmem:[%s1600_s4 + $0x98] sm:$0xff] }
  0x26   :  { %375 = vperm.xlu1 %1000, %v955_v19   ;;  %370 = vperm.xlu0 %999, %v954_v20   ;;  %v983_v59 = vld [vmem:[%s1600_s4 + $0xc8] sm:$0xff]  ;;  %v982_v60 = vld [vmem:[%s1600_s4 + $0xc0] sm:$0xff]  ;;  %v984_v61 = vld [vmem:[%s1600_s4 + $0xd0] sm:$0xff] }
  0x27   :  { %v977_v62 = vld [vmem:[%s1600_s4 + $0xb8] sm:$0xff]  ;;  %v991_v63 = vld [vmem:[%s1600_s4 + $0xe8] sm:$0xff]  ;;  %v990_v0 = vld [vmem:[%s1600_s4 + $0xe0] sm:$0xff] }
  0x28   :  { %v992_v1 = vld [vmem:[%s1600_s4 + $0xf0] sm:$0xff]  ;;  %v985_v2 = vld [vmem:[%s1600_s4 + $0xd8] sm:$0xff]  ;;  %v1321_v6 = vld [vmem:[%s1596_s0] sm:$0xff] }
  0x29   :  { %v993_v7 = vld [vmem:[%s1600_s4 + $0xf8] sm:$0xff]  ;;  %v29_v8 = vld [vmem:[%s1601_s5] sm:$0xff]  ;;  %v30_v13 = vld [vmem:[%s1601_s5 + $0x8] sm:$0xff] }
  0x2a   :  { %380 = vperm.xlu1 %1000, %v956_v21   ;;  %287 = vperm.xlu0 %999, %v949_v22   ;;  %v31_v14 = vld [vmem:[%s1601_s5 + $0x10] sm:$0xff]  ;;  %v32_v20 = vld [vmem:[%s1601_s5 + $0x18] sm:$0xff] }
  0x2b   :  { %v935_v21 = vld [vmem:[%s1598_s2 + $0x18] sm:$0xff] }
  0x2e   :  { %473 = vperm.xlu1 %1000, %v963_v23   ;;  %468 = vperm.xlu0 %999, %v962_v24  }
  0x32   :  { %478 = vperm.xlu1 %1000, %v964_v25   ;;  %385 = vperm.xlu0 %999, %v957_v26  }
  0x36   :  { %571 = vperm.xlu1 %1000, %v971_v27   ;;  %566 = vperm.xlu0 %999, %v970_v28  }
  0x3a   :  { %576 = vperm.xlu1 %1000, %v972_v29   ;;  %483 = vperm.xlu0 %999, %v965_v30  }
  0x3e   :  { %669 = vperm.xlu1 %1000, %v979_v31   ;;  %664 = vperm.xlu0 %999, %v978_v32   ;;  %v936_v31 = vld [vmem:[%s1598_s2 + $0x20] sm:$0xff]  ;;  %v1356_v32 = vld [vmem:[%s1596_s0 + $0x8] sm:$0x3] }
  0x42   :  { %674 = vperm.xlu1 %1000, %v980_v33   ;;  %581 = vperm.xlu0 %999, %v973_v34  }
  0x46   :  { %767 = vperm.xlu1 %1000, %v987_v35   ;;  %762 = vperm.xlu0 %999, %v986_v36   ;;  %v1359_v36 = vsub.s32 1, %v1329_v9 }
  0x4a   :  { %772 = vperm.xlu1 %1000, %v988_v37   ;;  %679 = vperm.xlu0 %999, %v981_v38   ;;  %v45_v37 = vrot.slane %v1356_v32, %v44_v15 }
  0x4e   :  { %226 = vperm.xlu1 %1000, %v942_v39   ;;  %777 = vperm.xlu0 %999, %v989_v40  }
  0x52   :  { %236 = vperm.xlu1 %1000, %v944_v41   ;;  %231 = vperm.xlu0 %999, %v943_v42  }
  0x56   :  { %329 = vperm.xlu1 %1000, %v951_v43   ;;  %324 = vperm.xlu0 %999, %v950_v44  }
  0x5a   :  { %334 = vperm.xlu1 %1000, %v952_v45   ;;  %241 = vperm.xlu0 %999, %v945_v46   ;;  %v268_v45 = vsub.s32 2, %v1329_v9 }
  0x5e   :  { %427 = vperm.xlu1 %1000, %v959_v47   ;;  %422 = vperm.xlu0 %999, %v958_v48   ;;  %v1078_v47 = vmov 0.0  }
  0x62   :  { %432 = vperm.xlu1 %1000, %v960_v49   ;;  %339 = vperm.xlu0 %999, %v953_v50  }
  0x66   :  { %525 = vperm.xlu1 %1000, %v967_v51   ;;  %520 = vperm.xlu0 %999, %v966_v52  }
  0x6a   :  { %530 = vperm.xlu1 %1000, %v968_v53   ;;  %437 = vperm.xlu0 %999, %v961_v54  }
  0x6e   :  { %623 = vperm.xlu1 %1000, %v975_v55   ;;  %618 = vperm.xlu0 %999, %v974_v56  }
  0x72   :  { %628 = vperm.xlu1 %1000, %v976_v57   ;;  %535 = vperm.xlu0 %999, %v969_v58  }
  0x76   :  { %721 = vperm.xlu1 %1000, %v983_v59   ;;  %716 = vperm.xlu0 %999, %v982_v60  }
  0x7a   :  { %726 = vperm.xlu1 %1000, %v984_v61   ;;  %633 = vperm.xlu0 %999, %v977_v62  }
  0x7e   :  { %819 = vperm.xlu1 %1000, %v991_v63   ;;  %814 = vperm.xlu0 %999, %v990_v0  }
  0x81   :  { %v63_v4 = vpop.permute.xlu1 %62  ;;  %v49_v5 = vpop.permute.xlu0 %48 }
  0x82   :  { %824 = vperm.xlu1 %1000, %v992_v1   ;;  %731 = vperm.xlu0 %999, %v985_v2   ;;  %vm51_vm0 = vcmp.ge.f32.partialorder %v45_v37, %v49_v5 }
  0x83   :  { %v1365_v48 = vsel %vm51_vm0, 1.0, %v1078_v47 }
  0x84   :  { %v121_v61 = vrot.slane %v1365_v48, %v44_v15 }
  0x85   :  { %v81_v10 = vpop.permute.xlu1 %80  ;;  %v57_v11 = vpop.permute.xlu0 %56 }
  0x86   :  { %v59_v12 = vsub.f32 %v1321_v6, %v57_v11  ;;  %829 = vperm.xlu0 %999, %v993_v7   ;;  %846 = vperm.xlu1 %1000, %v29_v8  }
  0x88   :  { %v1339_v16 = vmul.f32 %v63_v4, %v59_v12 }
  0x89   :  { %v91_v17 = vpop.permute.xlu1 %90  ;;  %v86_v18 = vpop.permute.xlu0 %85 }
  0x8a   :  { %v77_v19 = vrot.slane %v1339_v16, %v44_v15  ;;  %851 = vperm.xlu0 %999, %v30_v13   ;;  %856 = vperm.xlu1 %1000, %v31_v14   ;;  %v171_v38 = vrot.slane %v1339_v16, %v1359_v36  ;;  %v1370_v57 = vrot.slane %v1339_v16, %v268_v45 }
  0x8c   :  { %v100_v22 = vsub.f32 %v77_v19, %v91_v17  ;;  %v99_v23 = vsub.f32 %v77_v19, %v86_v18  ;;  %v98_v24 = vsub.f32 %v77_v19, %v81_v10  ;;  %v366_v17 = vsub.s32 3, %v1329_v9 }
  0x8d   :  { %v1348_v25 = vpop.permute.xlu1 %132  ;;  %v96_v26 = vpop.permute.xlu0 %95 }
  0x8e   :  { %v104_v27 = vmul.f32 0.5, %v100_v22  ;;  %v103_v28 = vmul.f32 0.5, %v99_v23  ;;  %v102_v29 = vmul.f32 0.5, %v98_v24  ;;  %v101_v30 = vsub.f32 %v77_v19, %v96_v26  ;;  %861 = vperm.xlu0 %999, %v32_v20   ;;  %873 = vperm.xlu1 %1000, %v935_v21  }
  0x90   :  { %1001 = vtanh.f32 %v104_v27  ;;  %v105_v33 = vmul.f32 0.5, %v101_v30 }
  0x91   :  { %1003 = vtanh.f32 %v103_v28  ;;  %v143_v34 = vpop.permute.xlu1 %142  ;;  %v138_v35 = vpop.permute.xlu0 %137 }
  0x92   :  { %1005 = vtanh.f32 %v102_v29  ;;  %879 = vperm.xlu0 %999, %v936_v31   ;;  %v1384_v29 = vrot.slane %v1339_v16, %v366_v17 }
  0x93   :  { %1007 = vtanh.f32 %v105_v33 }
  0x95   :  { %v175_v39 = vpop.permute.xlu1 %174  ;;  %v148_v40 = vpop.permute.xlu0 %147 }
  0x96   :  { %v192_v41 = vsub.f32 %v171_v38, %v175_v39 }
  0x98   :  { %v196_v42 = vmul.f32 0.5, %v192_v41 }
  0x99   :  { %v185_v43 = vpop.permute.xlu1 %184  ;;  %v180_v44 = vpop.permute.xlu0 %179 }
  0x9a   :  { %v1002_v46 = vpop.eup %1001  ;;  %1009 = vtanh.f32 %v196_v42  ;;  %v194_v49 = vsub.f32 %v171_v38, %v185_v43  ;;  %v193_v50 = vsub.f32 %v171_v38, %v180_v44  ;;  %v1395_v42 = vrot.slane %v1365_v48, %v1359_v36 }
  0x9b   :  { %v1004_v51 = vpop.eup %1003  ;;  %v112_v52 = vmul.f32 0.5, %v1002_v46 }
  0x9c   :  { %v1006_v53 = vpop.eup %1005  ;;  %v111_v54 = vmul.f32 0.5, %v1004_v51  ;;  %v198_v55 = vmul.f32 0.5, %v194_v49  ;;  %v197_v56 = vmul.f32 0.5, %v193_v50 }
  0x9d   :  { %v1008_v58 = vpop.eup %1007  ;;  %v116_v59 = vadd.f32 0.5, %v112_v52  ;;  %v110_v60 = vmul.f32 0.5, %v1006_v53  ;;  %v278_v62 = vpop.permute.xlu1 %277 }
  0x9e   :  { %v273_v63 = vpop.permute.xlu0 %272  ;;  %v115_v0 = vadd.f32 0.5, %v111_v54  ;;  %v113_v1 = vmul.f32 0.5, %v1008_v58  ;;  %1011 = vtanh.f32 %v198_v55  ;;  %v291_v2 = vsub.f32 %v1370_v57, %v278_v62 }
  0x9f   :  { %v114_v3 = vadd.f32 0.5, %v110_v60  ;;  %v124_v4 = vmul.f32 %v121_v61, %v116_v59  ;;  %1013 = vtanh.f32 %v197_v56  ;;  %v290_v5 = vsub.f32 %v1370_v57, %v273_v63 }
  0xa0   :  { %v117_v7 = vadd.f32 0.5, %v113_v1  ;;  %v123_v8 = vmul.f32 %v121_v61, %v115_v0  ;;  %v295_v10 = vmul.f32 0.5, %v291_v2 }
  0xa1   :  { %v122_v11 = vmul.f32 %v121_v61, %v114_v3  ;;  %v128_v12 = vsub.f32 1.0, %v124_v4  ;;  %v294_v13 = vmul.f32 0.5, %v290_v5  ;;  %v283_v14 = vpop.permute.xlu1 %282 }
  0xa2   :  { %v190_v15 = vpop.permute.xlu0 %189  ;;  %v127_v18 = vsub.f32 1.0, %v123_v8  ;;  %v125_v19 = vmul.f32 %v121_v61, %v117_v7  ;;  %1015 = vtanh.f32 %v295_v10  ;;  %v292_v20 = vsub.f32 %v1370_v57, %v283_v14 }
  0xa3   :  { %v126_v21 = vsub.f32 1.0, %v122_v11  ;;  %v1377_v22 = vmul.f32 %v143_v34, %v128_v12  ;;  %1017 = vtanh.f32 %v294_v13  ;;  %v195_v23 = vsub.f32 %v171_v38, %v190_v15 }
  0xa4   :  { %v1010_v24 = vpop.eup %1009  ;;  %v1379_v26 = vmul.f32 %v138_v35, %v127_v18  ;;  %v129_v27 = vsub.f32 1.0, %v125_v19  ;;  %v296_v28 = vmul.f32 0.5, %v292_v20  ;;  %v1419_v8 = vrot.slane %v1365_v48, %v268_v45 }
  0xa5   :  { %v1387_v30 = vmul.f32 %v1348_v25, %v126_v21  ;;  %v204_v31 = vmul.f32 0.5, %v1010_v24  ;;  %v199_v33 = vmul.f32 0.5, %v195_v23  ;;  %v376_v37 = vpop.permute.xlu1 %375  ;;  %v562_v20 = vsub.s32 5, %v1329_v9 }
  0xa6   :  { %v371_v34 = vpop.permute.xlu0 %370  ;;  %v1389_v39 = vmul.f32 %v148_v40, %v129_v27  ;;  %1019 = vtanh.f32 %v296_v28  ;;  %v389_v35 = vsub.f32 %v1384_v29, %v376_v37  ;;  %v464_v40 = vsub.s32 4, %v1329_v9 }
  0xa7   :  { %v208_v38 = vadd.f32 0.5, %v204_v31  ;;  %1021 = vtanh.f32 %v199_v33  ;;  %v388_v41 = vsub.f32 %v1384_v29, %v371_v34 }
  0xa8   :  { %v1012_v43 = vpop.eup %1011  ;;  %v393_v25 = vmul.f32 0.5, %v389_v35  ;;  %v1406_v61 = vrot.slane %v1339_v16, %v464_v40  ;;  %v1433_v35 = vrot.slane %v1339_v16, %v562_v20 }
  0xa9   :  { %v1014_v44 = vpop.eup %1013  ;;  %v206_v46 = vmul.f32 0.5, %v1012_v43  ;;  %v392_v47 = vmul.f32 0.5, %v388_v41  ;;  %v381_v49 = vpop.permute.xlu1 %380  ;;  %v1399_v51 = vmul.f32 %v1395_v42, %v208_v38 }
  0xaa   :  { %v288_v50 = vpop.permute.xlu0 %287  ;;  %v205_v52 = vmul.f32 0.5, %v1014_v44  ;;  %1023 = vtanh.f32 %v393_v25  ;;  %v390_v53 = vsub.f32 %v1384_v29, %v381_v49 }
  0xab   :  { %v293_v54 = vsub.f32 %v1370_v57, %v288_v50  ;;  %v210_v55 = vadd.f32 0.5, %v206_v46  ;;  %1025 = vtanh.f32 %v392_v47 }
  0xac   :  { %v1016_v56 = vpop.eup %1015  ;;  %v209_v58 = vadd.f32 0.5, %v205_v52  ;;  %v394_v59 = vmul.f32 0.5, %v390_v53  ;;  %v1446_v52 = vrot.slane %v1365_v48, %v366_v17 }
  0xad   :  { %v297_v60 = vmul.f32 0.5, %v293_v54  ;;  %v1018_v62 = vpop.eup %1017  ;;  %v303_v63 = vmul.f32 0.5, %v1016_v56  ;;  %v474_v0 = vpop.permute.xlu1 %473  ;;  %v1409_v2 = vmul.f32 %v1395_v42, %v210_v55 }
  0xae   :  { %v469_v1 = vpop.permute.xlu0 %468  ;;  %v302_v3 = vmul.f32 0.5, %v1018_v62  ;;  %1027 = vtanh.f32 %v394_v59  ;;  %v487_v57 = vsub.f32 %v1406_v61, %v474_v0  ;;  %v1414_v7 = vmul.f32 %v1395_v42, %v209_v58 }
  0xaf   :  { %v486_v4 = vsub.f32 %v1406_v61, %v469_v1  ;;  %v307_v5 = vadd.f32 0.5, %v303_v63  ;;  %1029 = vtanh.f32 %v297_v60  ;;  %v660_v63 = vsub.s32 6, %v1329_v9 }
  0xb0   :  { %v1020_v10 = vpop.eup %1019  ;;  %v306_v11 = vadd.f32 0.5, %v302_v3  ;;  %v491_v12 = vmul.f32 0.5, %v487_v57 }
  0xb1   :  { %v490_v13 = vmul.f32 0.5, %v486_v4  ;;  %v1022_v14 = vpop.eup %1021  ;;  %v304_v15 = vmul.f32 0.5, %v1020_v10  ;;  %v479_v18 = vpop.permute.xlu1 %478  ;;  %v1423_v21 = vmul.f32 %v1419_v8, %v307_v5 }
  0xb2   :  { %v386_v19 = vpop.permute.xlu0 %385  ;;  %v207_v23 = vmul.f32 0.5, %v1022_v14  ;;  %1031 = vtanh.f32 %v491_v12  ;;  %v488_v24 = vsub.f32 %v1406_v61, %v479_v18  ;;  %v1428_v28 = vmul.f32 %v1419_v8, %v306_v11 }
  0xb3   :  { %v391_v45 = vsub.f32 %v1384_v29, %v386_v19  ;;  %v308_v27 = vadd.f32 0.5, %v304_v15  ;;  %1033 = vtanh.f32 %v490_v13  ;;  %v1460_v12 = vrot.slane %v1339_v16, %v660_v63 }
  0xb4   :  { %v1024_v31 = vpop.eup %1023  ;;  %v211_v33 = vadd.f32 0.5, %v207_v23  ;;  %v492_v37 = vmul.f32 0.5, %v488_v24 }
  0xb5   :  { %v395_v34 = vmul.f32 0.5, %v391_v45  ;;  %v1026_v38 = vpop.eup %1025  ;;  %v401_v41 = vmul.f32 0.5, %v1024_v31  ;;  %v572_v43 = vpop.permute.xlu1 %571  ;;  %v1436_v29 = vmul.f32 %v1419_v8, %v308_v27  ;;  %v1473_v31 = vrot.slane %v1365_v48, %v464_v40 }
  0xb6   :  { %v567_v25 = vpop.permute.xlu0 %566  ;;  %v400_v44 = vmul.f32 0.5, %v1026_v38  ;;  %1035 = vtanh.f32 %v492_v37  ;;  %v585_v46 = vsub.f32 %v1433_v35, %v572_v43  ;;  %v1441_v50 = vmul.f32 %v1395_v42, %v211_v33 }
  0xb7   :  { %v584_v47 = vsub.f32 %v1433_v35, %v567_v25  ;;  %v405_v49 = vadd.f32 0.5, %v401_v41  ;;  %1037 = vtanh.f32 %v395_v34 }
  0xb8   :  { %v1028_v53 = vpop.eup %1027  ;;  %v404_v54 = vadd.f32 0.5, %v400_v44  ;;  %v589_v55 = vmul.f32 0.5, %v585_v46  ;;  %v758_v46 = vsub.s32 7, %v1329_v9 }
  0xb9   :  { %v588_v56 = vmul.f32 0.5, %v584_v47  ;;  %v1030_v58 = vpop.eup %1029  ;;  %v402_v59 = vmul.f32 0.5, %v1028_v53  ;;  %v577_v60 = vpop.permute.xlu1 %576  ;;  %v1450_v0 = vmul.f32 %v1446_v52, %v405_v49 }
  0xba   :  { %v484_v62 = vpop.permute.xlu0 %483  ;;  %v305_v42 = vmul.f32 0.5, %v1030_v58  ;;  %1039 = vtanh.f32 %v589_v55  ;;  %v586_v1 = vsub.f32 %v1433_v35, %v577_v60  ;;  %v1455_v57 = vmul.f32 %v1446_v52, %v404_v54 }
  0xbb   :  { %v489_v17 = vsub.f32 %v1406_v61, %v484_v62  ;;  %v406_v3 = vadd.f32 0.5, %v402_v59  ;;  %1041 = vtanh.f32 %v588_v56  ;;  %v759_v60 = vrot.slane %v1339_v16, %v758_v46 }
  0xbc   :  { %v1032_v4 = vpop.eup %1031  ;;  %v309_v5 = vadd.f32 0.5, %v305_v42  ;;  %v590_v10 = vmul.f32 0.5, %v586_v1  ;;  %v1496_v16 = vrot.slane %v1365_v48, %v562_v20 }
  0xbd   :  { %v493_v11 = vmul.f32 0.5, %v489_v17  ;;  %v1034_v13 = vpop.eup %1033  ;;  %v499_v14 = vmul.f32 0.5, %v1032_v4  ;;  %v670_v15 = vpop.permute.xlu1 %669  ;;  %v1463_v61 = vmul.f32 %v1446_v52, %v406_v3 }
  0xbe   :  { %v665_v18 = vpop.permute.xlu0 %664  ;;  %v498_v19 = vmul.f32 0.5, %v1034_v13  ;;  %1043 = vtanh.f32 %v590_v10  ;;  %v683_v23 = vsub.f32 %v1460_v12, %v670_v15  ;;  %v1468_v27 = vmul.f32 %v1419_v8, %v309_v5 }
  0xbf   :  { %v682_v24 = vsub.f32 %v1460_v12, %v665_v18  ;;  %v503_v45 = vadd.f32 0.5, %v499_v14  ;;  %1045 = vtanh.f32 %v493_v11 }
  0xc0   :  { %v1036_v33 = vpop.eup %1035  ;;  %v502_v37 = vadd.f32 0.5, %v498_v19  ;;  %v687_v34 = vmul.f32 0.5, %v683_v23 }
  0xc1   :  { %v686_v38 = vmul.f32 0.5, %v682_v24  ;;  %v1038_v41 = vpop.eup %1037  ;;  %v500_v43 = vmul.f32 0.5, %v1036_v33  ;;  %v675_v25 = vpop.permute.xlu1 %674  ;;  %v1477_v47 = vmul.f32 %v1473_v31, %v503_v45 }
  0xc2   :  { %v582_v44 = vpop.permute.xlu0 %581  ;;  %v403_v8 = vmul.f32 0.5, %v1038_v41  ;;  %1047 = vtanh.f32 %v687_v34  ;;  %v684_v49 = vsub.f32 %v1460_v12, %v675_v25  ;;  %v1482_v54 = vmul.f32 %v1473_v31, %v502_v37 }
  0xc3   :  { %v587_v40 = vsub.f32 %v1433_v35, %v582_v44  ;;  %v504_v53 = vadd.f32 0.5, %v500_v43  ;;  %1049 = vtanh.f32 %v686_v38 }
  0xc4   :  { %v1040_v55 = vpop.eup %1039  ;;  %v407_v56 = vadd.f32 0.5, %v403_v8  ;;  %v688_v58 = vmul.f32 0.5, %v684_v49  ;;  %v220_v8 = vsub.f32 1.0, %v1399_v51 }
  0xc5   :  { %v591_v59 = vmul.f32 0.5, %v587_v40  ;;  %v1042_v62 = vpop.eup %1041  ;;  %v597_v42 = vmul.f32 0.5, %v1040_v55  ;;  %v768_v1 = vpop.permute.xlu1 %767  ;;  %v1488_v3 = vmul.f32 %v1473_v31, %v504_v53 }
  0xc6   :  { %v763_v17 = vpop.permute.xlu0 %762  ;;  %v596_v35 = vmul.f32 0.5, %v1042_v62  ;;  %1051 = vtanh.f32 %v688_v58  ;;  %v781_v4 = vsub.f32 %v759_v60, %v768_v1  ;;  %v1491_v11 = vmul.f32 %v1446_v52, %v407_v56 }
  0xc7   :  { %v780_v5 = vsub.f32 %v759_v60, %v763_v17  ;;  %v601_v10 = vadd.f32 0.5, %v597_v42  ;;  %1053 = vtanh.f32 %v591_v59  ;;  %v154_v42 = vsub.f32 1.0, %v1387_v30 }
  0xc8   :  { %v1044_v13 = vpop.eup %1043  ;;  %v600_v14 = vadd.f32 0.5, %v596_v35  ;;  %v785_v15 = vmul.f32 0.5, %v781_v4 }
  0xc9   :  { %v784_v18 = vmul.f32 0.5, %v780_v5  ;;  %v1046_v19 = vpop.eup %1045  ;;  %v598_v23 = vmul.f32 0.5, %v1044_v13  ;;  %v773_v24 = vpop.permute.xlu1 %772  ;;  %v1499_v33 = vmul.f32 %v1496_v16, %v601_v10  ;;  %v222_v10 = vsub.f32 1.0, %v1409_v2 }
  0xca   :  { %v680_v45 = vpop.permute.xlu0 %679  ;;  %v501_v37 = vmul.f32 0.5, %v1046_v19  ;;  %1055 = vtanh.f32 %v785_v15  ;;  %v782_v52 = vsub.f32 %v759_v60, %v773_v24  ;;  %v1503_v20 = vmul.f32 %v1496_v16, %v600_v14 }
  0xcb   :  { %v685_v34 = vsub.f32 %v1460_v12, %v680_v45  ;;  %v602_v38 = vadd.f32 0.5, %v598_v23  ;;  %1057 = vtanh.f32 %v784_v18  ;;  %v1512_v12 = vrot.slane %v1365_v48, %v660_v63 }
  0xcc   :  { %v1048_v41 = vpop.eup %1047  ;;  %v505_v43 = vadd.f32 0.5, %v501_v37  ;;  %v786_v25 = vmul.f32 0.5, %v782_v52  ;;  %v221_v18 = vsub.f32 1.0, %v1414_v7  ;;  %v156_v23 = vsub.f32 1.0, %v1377_v22 }
  0xcd   :  { %v689_v44 = vmul.f32 0.5, %v685_v34  ;;  %v1050_v49 = vpop.eup %1049  ;;  %v695_v40 = vmul.f32 0.5, %v1048_v41  ;;  %v227_v53 = vpop.permute.xlu1 %226  ;;  %v1507_v56 = vmul.f32 %v1496_v16, %v602_v38  ;;  %v319_v38 = vsub.f32 1.0, %v1423_v21 }
  0xce   :  { %v778_v55 = vpop.permute.xlu0 %777  ;;  %v694_v58 = vmul.f32 0.5, %v1050_v49  ;;  %1059 = vtanh.f32 %v786_v25  ;;  %v244_v59 = vmul.f32 %v227_v53, %v220_v8  ;;  %v1516_v51 = vmul.f32 %v1473_v31, %v505_v43 }
  0xcf   :  { %v783_v62 = vsub.f32 %v759_v60, %v778_v55  ;;  %v699_v1 = vadd.f32 0.5, %v695_v40  ;;  %1061 = vtanh.f32 %v689_v44  ;;  %v318_v7 = vsub.f32 1.0, %v1428_v28 }
  0xd0   :  { %v1052_v17 = vpop.eup %1051  ;;  %v698_v35 = vadd.f32 0.5, %v694_v58  ;;  %v248_v4 = vsub.f32 1.0, %v244_v59  ;;  %v155_v43 = vsub.f32 1.0, %v1379_v26  ;;  %v803_v26 = vrot.slane %v1365_v48, %v758_v46 }
  0xd1   :  { %v787_v5 = vmul.f32 0.5, %v783_v62  ;;  %v1054_v13 = vpop.eup %1053  ;;  %v696_v63 = vmul.f32 0.5, %v1052_v17  ;;  %v237_v14 = vpop.permute.xlu1 %236  ;;  %v1521_v60 = vmul.f32 %v1512_v12, %v699_v1 }
  0xd2   :  { %v232_v15 = vpop.permute.xlu0 %231  ;;  %v599_v30 = vmul.f32 0.5, %v1054_v13  ;;  %v252_v19 = vmul.f32 %v248_v4, %v154_v42  ;;  %v246_v31 = vmul.f32 %v237_v14, %v222_v10  ;;  %v1525_v37 = vmul.f32 %v1512_v12, %v698_v35 }
  0xd3   :  { %1063 = vtanh.f32 %v787_v5  ;;  %v700_v24 = vadd.f32 0.5, %v696_v63  ;;  %v245_v45 = vmul.f32 %v232_v15, %v221_v18  ;;  %v320_v35 = vsub.f32 1.0, %v1436_v29 }
  0xd4   :  { %v1056_v2 = vpop.eup %1055  ;;  %v603_v52 = vadd.f32 0.5, %v599_v30  ;;  %v250_v34 = vsub.f32 1.0, %v246_v31  ;;  %v223_v63 = vsub.f32 1.0, %v1441_v50  ;;  %v417_v29 = vsub.f32 1.0, %v1450_v0 }
  0xd5   :  { %v1058_v41 = vpop.eup %1057  ;;  %v793_v25 = vmul.f32 0.5, %v1056_v2  ;;  %v249_v44 = vsub.f32 1.0, %v245_v45  ;;  %v330_v8 = vpop.permute.xlu1 %329  ;;  %v1531_v22 = vmul.f32 %v1512_v12, %v700_v24  ;;  %v416_v2 = vsub.f32 1.0, %v1455_v57 }
  0xd6   :  { %v325_v49 = vpop.permute.xlu0 %324  ;;  %v792_v40 = vmul.f32 0.5, %v1058_v41  ;;  %v254_v53 = vmul.f32 %v250_v34, %v156_v23  ;;  %v343_v55 = vmul.f32 %v330_v8, %v319_v38  ;;  %v1534_v21 = vmul.f32 %v1496_v16, %v603_v52 }
  0xd7   :  { %v342_v58 = vmul.f32 %v325_v49, %v318_v7  ;;  %v797_v59 = vadd.f32 0.5, %v793_v25  ;;  %v253_v62 = vmul.f32 %v249_v44, %v155_v43  ;;  %v157_v52 = vsub.f32 1.0, %v1389_v39 }
  0xd8   :  { %v1060_v28 = vpop.eup %1059  ;;  %v796_v42 = vadd.f32 0.5, %v792_v40  ;;  %v347_v1 = vsub.f32 1.0, %v343_v55  ;;  %v418_v57 = vsub.f32 1.0, %v1463_v61  ;;  %v321_v39 = vsub.f32 1.0, %v1468_v27 }
  0xd9   :  { %v346_v17 = vsub.f32 1.0, %v342_v58  ;;  %v1062_v4 = vpop.eup %1061  ;;  %v794_v5 = vmul.f32 0.5, %v1060_v28  ;;  %v335_v10 = vpop.permute.xlu1 %334  ;;  %v1541_v14 = vmul.f32 %v803_v26, %v797_v59 }
  0xda   :  { %v242_v13 = vpop.permute.xlu0 %241  ;;  %v697_v16 = vmul.f32 0.5, %v1062_v4  ;;  %v351_v15 = vmul.f32 %v347_v1, %v253_v62  ;;  %v344_v9 = vmul.f32 %v335_v10, %v320_v35  ;;  %v1543_v31 = vmul.f32 %v803_v26, %v796_v42 }
  0xdb   :  { %v350_v18 = vmul.f32 %v346_v17, %v252_v19  ;;  %v798_v30 = vadd.f32 0.5, %v794_v5  ;;  %v247_v46 = vmul.f32 %v242_v13, %v223_v63  ;;  %v514_v35 = vsub.f32 1.0, %v1482_v54 }
  0xdc   :  { %v701_v24 = vadd.f32 0.5, %v697_v16  ;;  %v348_v45 = vsub.f32 1.0, %v344_v9 }
  0xdd   :  { %v1064_v23 = vpop.eup %1063  ;;  %v251_v34 = vsub.f32 1.0, %v247_v46  ;;  %v428_v38 = vpop.permute.xlu1 %427  ;;  %v1548_v41 = vmul.f32 %v803_v26, %v798_v30 }
  0xde   :  { %v795_v50 = vmul.f32 0.5, %v1064_v23  ;;  %v423_v7 = vpop.permute.xlu0 %422  ;;  %v352_v19 = vmul.f32 %v348_v45, %v254_v53  ;;  %v441_v43 = vmul.f32 %v428_v38, %v417_v29  ;;  %v1551_v44 = vmul.f32 %v1512_v12, %v701_v24 }
  0xdf   :  { %v440_v25 = vmul.f32 %v423_v7, %v416_v2  ;;  %v255_v49 = vmul.f32 %v251_v34, %v157_v52  ;;  %v515_v12 = vsub.f32 1.0, %v1477_v47  ;;  %v613_v45 = vsub.f32 1.0, %v1499_v33 }
  0xe0   :  { %v799_v8 = vadd.f32 0.5, %v795_v50  ;;  %v445_v40 = vsub.f32 1.0, %v441_v43  ;;  %v612_v29 = vsub.f32 1.0, %v1503_v20  ;;  %v517_v43 = vsub.f32 1.0, %v1516_v51 }
  0xe1   :  { %v444_v0 = vsub.f32 1.0, %v440_v25  ;;  %v433_v55 = vpop.permute.xlu1 %432 }
  0xe2   :  { %v340_v58 = vpop.permute.xlu0 %339  ;;  %v1555_v59 = vmul.f32 %v803_v26, %v799_v8  ;;  %v449_v62 = vmul.f32 %v445_v40, %v351_v15  ;;  %v442_v53 = vmul.f32 %v433_v55, %v418_v57  ;;  %v516_v26 = vsub.f32 1.0, %v1488_v3 }
  0xe3   :  { %v448_v28 = vmul.f32 %v444_v0, %v350_v18  ;;  %v345_v42 = vmul.f32 %v340_v58, %v321_v39  ;;  %v419_v15 = vsub.f32 1.0, %v1491_v11  ;;  %v711_v39 = vsub.f32 1.0, %v1521_v60 }
  0xe4   :  { %v446_v1 = vsub.f32 1.0, %v442_v53  ;;  %v710_v55 = vsub.f32 1.0, %v1525_v37 }
  0xe5   :  { %v349_v17 = vsub.f32 1.0, %v345_v42  ;;  %v526_v4 = vpop.permute.xlu1 %525 }
  0xe6   :  { %v521_v5 = vpop.permute.xlu0 %520  ;;  %v450_v10 = vmul.f32 %v446_v1, %v352_v19  ;;  %v539_v13 = vmul.f32 %v526_v4, %v515_v12  ;;  %v614_v19 = vsub.f32 1.0, %v1507_v56  ;;  %v615_v12 = vsub.f32 1.0, %v1534_v21 }
  0xe7   :  { %v353_v61 = vmul.f32 %v349_v17, %v255_v49  ;;  %v538_v27 = vmul.f32 %v521_v5, %v514_v35  ;;  %v712_v17 = vsub.f32 1.0, %v1531_v22 }
  0xe8   :  { %v543_v63 = vsub.f32 1.0, %v539_v13 }
  0xe9   :  { %v542_v16 = vsub.f32 1.0, %v538_v27  ;;  %v531_v18 = vpop.permute.xlu1 %530  ;;  %v809_v27 = vsub.f32 1.0, %v1541_v14 }
  0xea   :  { %v438_v9 = vpop.permute.xlu0 %437  ;;  %v547_v30 = vmul.f32 %v543_v63, %v449_v62  ;;  %v540_v23 = vmul.f32 %v531_v18, %v516_v26  ;;  %v808_v63 = vsub.f32 1.0, %v1543_v31 }
  0xeb   :  { %v546_v46 = vmul.f32 %v542_v16, %v448_v28  ;;  %v443_v47 = vmul.f32 %v438_v9, %v419_v15 }
  0xec   :  { %v544_v24 = vsub.f32 1.0, %v540_v23  ;;  %v713_v23 = vsub.f32 1.0, %v1551_v44 }
  0xed   :  { %v447_v54 = vsub.f32 1.0, %v443_v47  ;;  %v624_v2 = vpop.permute.xlu1 %623 }
  0xee   :  { %v619_v52 = vpop.permute.xlu0 %618  ;;  %v548_v50 = vmul.f32 %v544_v24, %v450_v10  ;;  %v637_v38 = vmul.f32 %v624_v2, %v613_v45 }
  0xef   :  { %v451_v34 = vmul.f32 %v447_v54, %v353_v61  ;;  %v636_v3 = vmul.f32 %v619_v52, %v612_v29  ;;  %v811_v52 = vsub.f32 1.0, %v1555_v59 }
  0xf0   :  { %v641_v7 = vsub.f32 1.0, %v637_v38 }
  0xf1   :  { %v640_v11 = vsub.f32 1.0, %v636_v3  ;;  %v629_v25 = vpop.permute.xlu1 %628 }
  0xf2   :  { %v536_v8 = vpop.permute.xlu0 %535  ;;  %v645_v49 = vmul.f32 %v641_v7, %v547_v30  ;;  %v638_v0 = vmul.f32 %v629_v25, %v614_v19 }
  0xf3   :  { %v644_v40 = vmul.f32 %v640_v11, %v546_v46  ;;  %v541_v33 = vmul.f32 %v536_v8, %v517_v43  ;;  %v810_v46 = vsub.f32 1.0, %v1548_v41 }
  0xf4   :  { %v642_v57 = vsub.f32 1.0, %v638_v0 }
  0xf5   :  { %v545_v20 = vsub.f32 1.0, %v541_v33  ;;  %v722_v58 = vpop.permute.xlu1 %721 }
  0xf6   :  { %v717_v62 = vpop.permute.xlu0 %716  ;;  %v646_v28 = vmul.f32 %v642_v57, %v548_v50  ;;  %v735_v42 = vmul.f32 %v722_v58, %v711_v39 }
  0xf7   :  { %v549_v53 = vmul.f32 %v545_v20, %v451_v34  ;;  %v734_v56 = vmul.f32 %v717_v62, %v710_v55  ;;  %v28_v62 = vld [vmem:[%s1597_s1] sm:$0xff] }
  0xf8   :  { %v739_v1 = vsub.f32 1.0, %v735_v42  ;;  %v897_v42 = vrot.slane %v1356_v32, %v1359_v36 }
  0xf9   :  { %v738_v51 = vsub.f32 1.0, %v734_v56  ;;  %v727_v35 = vpop.permute.xlu1 %726 }
  0xfa   :  { %v634_v4 = vpop.permute.xlu0 %633  ;;  %v743_v5 = vmul.f32 %v739_v1, %v645_v49  ;;  %v736_v61 = vmul.f32 %v727_v35, %v712_v17 }
  0xfb   :  { %v742_v10 = vmul.f32 %v738_v51, %v644_v40  ;;  %v639_v60 = vmul.f32 %v634_v4, %v615_v12 }
  0xfc   :  { %v740_v13 = vsub.f32 1.0, %v736_v61 }
  0xfd   :  { %v643_v37 = vsub.f32 1.0, %v639_v60  ;;  %v820_v16 = vpop.permute.xlu1 %819 }
  0xfe   :  { %v815_v26 = vpop.permute.xlu0 %814  ;;  %v744_v15 = vmul.f32 %v740_v13, %v646_v28  ;;  %v833_v9 = vmul.f32 %v820_v16, %v809_v27 }
  0xff   :  { %v647_v18 = vmul.f32 %v643_v37, %v549_v53  ;;  %v832_v22 = vmul.f32 %v815_v26, %v808_v63 }
 0x100   :  { %v837_v30 = vsub.f32 1.0, %v833_v9 }
 0x101   :  { %v836_v21 = vsub.f32 1.0, %v832_v22  ;;  %v825_v47 = vpop.permute.xlu1 %824 }
 0x102   :  { %v732_v24 = vpop.permute.xlu0 %731  ;;  %v834_v54 = vmul.f32 %v825_v47, %v810_v46  ;;  %v841_v14 = vmul.f32 %v837_v30, %v743_v5 }
 0x103   :  { %v737_v45 = vmul.f32 %v732_v24, %v713_v23  ;;  %v840_v29 = vmul.f32 %v836_v21, %v742_v10 }
 0x104   :  { %v838_v2 = vsub.f32 1.0, %v834_v54 }
 0x105   :  { %v741_v31 = vsub.f32 1.0, %v737_v45  ;;  %v847_v34 = vpop.permute.xlu1 %846 }
 0x106   :  { %v830_v50 = vpop.permute.xlu0 %829  ;;  %v842_v7 = vmul.f32 %v838_v2, %v744_v15  ;;  %v864_v43 = vmul.f32 %v847_v34, %v840_v29 }
 0x107   :  { %v745_v38 = vmul.f32 %v741_v31, %v647_v18  ;;  %v835_v3 = vmul.f32 %v830_v50, %v811_v52 }
 0x109   :  { %v839_v11 = vsub.f32 1.0, %v835_v3  ;;  %v857_v41 = vpop.permute.xlu1 %856 }
 0x10a   :  { %v852_v19 = vpop.permute.xlu0 %851  ;;  %v866_v49 = vmul.f32 %v857_v41, %v842_v7 }
 0x10b   :  { %v865_v44 = vmul.f32 %v852_v19, %v841_v14  ;;  %v843_v25 = vmul.f32 %v839_v11, %v745_v38 }
 0x10d   :  { %v868_v8 = vadd.f32 %v865_v44, %v864_v43  ;;  %v874_v20 = vpop.permute.xlu1 %873 }
 0x10e   :  { %v862_v40 = vpop.permute.xlu0 %861 }
 0x10f   :  { %v869_v0 = vadd.f32 %v868_v8, %v866_v49  ;;  %v867_v33 = vmul.f32 %v862_v40, %v843_v25 }
 0x111   :  { %v870_v57 = vadd.f32 %v869_v0, %v867_v33 }
 0x112   :  { %v880_v39 = vpop.permute.xlu0 %879 }
 0x113   :  { %v876_v59 = vadd.f32 %v874_v20, %v870_v57  ;;  %v882_v55 = vmul.f32 %v880_v39, %v1321_v6 }
 0x115   :  { %v883_v58 = vsub.f32 %v876_v59, %v882_v55 }
 0x117   :  { %v884_v28 = vmul.f32 %v1365_v48, %v883_v58 }
 0x119   :  { %885 = vst [vmem:[%s1602_s6] sm:$0xff] %v884_v28  ;;  %v886_v53 = vsub.f32 %v884_v28, %v28_v62  ;;  %s1065_s6 = scalar_lea.hbm %s1603_s7, 16 }
 0x11a   :  { %p1066_p0 = scmp.ne.s32.totalorder %s1603_s7, %s1065_s6  ;;  %p1069_p1 = scmp.lt.u32.totalorder %s1065_s6, %s1603_s7 }
 0x11b   :  { %v893_v56 = vmul.f32 %v886_v53, %v886_v53 }
 0x11c   :  { %p1071_p2 = pnand %p1069_p1, %p1066_p0 }
 0x11d   :  { %v898_v1 = vmul.f32 %v897_v42, %v893_v56 }
 0x11f   :  { %905 = vadd.xlane.f32.xlu1 %v898_v1 }
 0x1ac   :  { %v906_v51 = vpop.xlane.xlu1 %905 }
 0x1ad   :  { %v907_v6 = vrot.slane %v906_v51, 4 }
 0x1af   :  { %v908_v17 = vadd.f32 %v907_v6, %v906_v51 }
 0x1b1   :  { %v909_v12 = vrot.slane %v908_v17, 2 }
 0x1b3   :  { %v910_v35 = vadd.f32 %v909_v12, %v908_v17 }
 0x1b5   :  { %v911_v4 = vrot.slane %v910_v35, 1 }
 0x1b7   :  { %v912_v5 = vadd.f32 %v911_v4, %v910_v35 }
 0x1b9   :  { %994 = vpush %v912_v5 }
 0x1ea   :  { %s995_s1 = spop %994 }
 0x1eb   :  { %915 = sst [smem:[#allocation3]] %s995_s1 }
 0x1ec   :  { %1074 = shalt.err (!%p1071_p2)
}
 0x1ed   :  { %s1079_s16 = smov [#allocation3]  }
 0x1ee   :  { %925 = dma.smem_to_hbm %s1079_s16, 16, %s1603_s7, [#allocation4]  }
 0x1ef   :  { %1075 = dma.done.wait [#allocation4], 16  }
 0x1f0   :  { %1076 = vsyncadd [#allocation4], 4294967280 }
 0x1f1   :  { %931 = sfence }
 0x1f2   :  { %932 = vsyncpa [#allocation4], 1 }

</bundles_post_ra>
